<compile_context>
chip_gen: v7x
topology: tpu7x:2x2x1
jax: 0.10.0
libtpu: 0.0.40
codegen_flags: <defaults>
</compile_context>

<pallas_src>
import jax
import jax.numpy as jnp
from jax.experimental import pallas as pl
from jax.experimental.pallas import tpu as pltpu

N_EMBD = 64
N_HEAD = 4
HEAD_SIZE = N_EMBD // N_HEAD   # 16
BLOCK_SIZE = 32                # max sequence length (causal mask size)
EPS = 1e-5                     # torch.nn.LayerNorm default eps
# dropout = 0.0 in the reference module -> identity, nothing to implement.


def _layernorm(x, w, b):
    mu = jnp.mean(x, axis=-1, keepdims=True)
    xc = x - mu
    var = jnp.mean(xc * xc, axis=-1, keepdims=True)
    return xc * jax.lax.rsqrt(var + EPS) * w + b


def block_kernel(x_ref, wqkv_ref, wproj_ref, w1_ref, w2_ref, vecs_ref, b1_ref,
                 o_ref):
    Bt, T, C = x_ref.shape
    N = Bt * T

    # Flattened (Bt*T, C) slab for all row-wise ops (big matmul M-dim).
    # T is padded to a multiple of 8 by the wrapper, so this reshape is free.
    xf = x_ref[...].reshape(N, C)

    ln1w = vecs_ref[0:1, :]
    ln1b = vecs_ref[1:2, :]
    ln2w = vecs_ref[2:3, :]
    ln2b = vecs_ref[3:4, :]
    bp = vecs_ref[4:5, :]
    b2 = vecs_ref[5:6, :]

    wdt = wqkv_ref.dtype   # bf16 MXU-operand dtype; accumulation stays f32.

    # ---- self-attention branch: x + proj(multi-head causal attention(ln1 x)) ----
    xn = _layernorm(xf, ln1w, ln1b)                                   # (N, C) f32
    # Fused QKV projection; 1/sqrt(C) is already folded into the Q columns.
    qkv = jnp.dot(xn.astype(wdt), wqkv_ref[...],
                  preferred_element_type=jnp.float32)                 # (N, 3C) f32
    qkv = qkv.reshape(Bt, T, 3 * C)

    row = jax.lax.broadcasted_iota(jnp.int32, (T, T), 0)
    col = jax.lax.broadcasted_iota(jnp.int32, (T, T), 1)
    causal = (row >= col)[None, :, :]                                 # (1, T, T)

    sa = jnp.zeros((N, C), jnp.float32)
    for h in range(N_HEAD):                  # static unroll over 4 heads
        s = h * HEAD_SIZE
        q = qkv[:, :, s:s + HEAD_SIZE]                                # (Bt, T, 16)
        k = qkv[:, :, C + s:C + s + HEAD_SIZE]
        v = qkv[:, :, 2 * C + s:2 * C + s + HEAD_SIZE]

        wei = jnp.einsum('btd,bsd->bts', q.astype(wdt), k.astype(wdt),
                         preferred_element_type=jnp.float32)          # (Bt, T, T)
        wei = jnp.where(causal, wei, -1e30)   # masked_fill(-inf) equivalent
        wei = wei - jnp.max(wei, axis=-1, keepdims=True)
        p = jnp.exp(wei)
        p = p * pl.reciprocal(jnp.sum(p, axis=-1, keepdims=True), approx=True)
        o_h = jnp.einsum('bts,bsd->btd', p.astype(wdt), v.astype(wdt),
                         preferred_element_type=jnp.float32)          # (Bt, T, 16)
        # Accumulate the output projection per head -> no concat needed.
        sa = sa + jnp.dot(o_h.reshape(N, HEAD_SIZE).astype(wdt),
                          wproj_ref[s:s + HEAD_SIZE, :],
                          preferred_element_type=jnp.float32)
    x1 = xf + sa + bp

    # ---- feed-forward branch: x + W2 relu(W1 ln2(x) + b1) + b2 ----
    yn = _layernorm(x1, ln2w, ln2b)
    h1 = jnp.dot(yn.astype(wdt), w1_ref[...],
                 preferred_element_type=jnp.float32) + b1_ref[...]
    h1 = jnp.maximum(h1, 0.0)
    ff = jnp.dot(h1.astype(wdt), w2_ref[...],
                 preferred_element_type=jnp.float32) + b2

    o_ref[...] = (x1 + ff).reshape(Bt, T, C)


# ---------------- grid / tiling selection -----------------------------------
def _ceil_div(a, b):
    return -(-a // b)


def _num_tensorcores():
    """Best-effort TensorCores-per-chip query (v7x = 2, v5e/v6e = 1)."""
    try:
        info = pltpu.get_tpu_info()
        for name in ("num_tensorcores", "tensorcore_count", "num_cores",
                     "cores_per_chip"):
            v = getattr(info, name, None)
            if isinstance(v, int) and 1 <= v <= 8:
                return v
    except Exception:
        pass
    try:
        if "v7" in jax.devices()[0].device_kind.lower():
            return 2
    except Exception:
        pass
    return 1   # conservative default: single TensorCore (v5e / v6e)


def _choose_grid(B, T, num_tc, target_rows=2048, max_rows=4096):
    """Pick Bt (batches per grid step) and the step count.

    Targets ~2048 rows (Bt*T) per step (cap 4096) so the flattened matmuls
    have a large M dimension and per-step fixed cost (~0.35 us) amortizes.
    Single-TC chips may use one step; on v7x the step count is kept a
    multiple of num_tc so megacore sharding is load-balanced.
    Returns (Bt, steps) with Bt * steps >= B (wrapper pads the remainder).
    """
    bt_cap = max(1, max_rows // T)
    bt = max(1, min(target_rows // T, bt_cap, B))
    steps = _ceil_div(B, bt)
    if num_tc >= 2 and B >= num_tc:
        steps = max(steps, num_tc)
        steps = _ceil_div(steps, num_tc) * num_tc
        bt = min(_ceil_div(B, steps), bt_cap)
        steps = _ceil_div(_ceil_div(B, bt), num_tc) * num_tc
    return bt, steps


def transformer_block(x, packed):
    B, T, C = x.shape
    assert C == N_EMBD and T <= BLOCK_SIZE

    num_tc = _num_tensorcores()
    # Pad T to a sublane multiple (8): keeps in-kernel reshapes relayout-free.
    # Causality guarantees real query rows never see padded key rows.
    Tp = max(8, _ceil_div(T, 8) * 8)
    Bt, steps = _choose_grid(B, Tp, num_tc)
    Bp = Bt * steps

    xp = x
    if Bp != B or Tp != T:
        xp = jnp.pad(x, ((0, Bp - B), (0, Tp - T), (0, 0)))

    weight_args = (packed["wqkv"], packed["wproj"], packed["w1"],
                   packed["w2"], packed["vecs"], packed["b1"])

    def full_spec(a):
        nd = a.ndim
        return pl.BlockSpec(a.shape, lambda b, _nd=nd: (0,) * _nd)

    in_specs = [pl.BlockSpec((Bt, Tp, C), lambda b: (b, 0, 0))]
    in_specs += [full_spec(a) for a in weight_args]

    out = pl.pallas_call(
        block_kernel,
        out_shape=jax.ShapeDtypeStruct((Bp, Tp, C), jnp.float32),
        grid=(steps,),
        in_specs=in_specs,
        out_specs=pl.BlockSpec((Bt, Tp, C), lambda b: (b, 0, 0)),
        compiler_params=pltpu.CompilerParams(
            dimension_semantics=("parallel",),
            # Raise the scoped-VMEM cap (16 MiB v5e / 32 MiB v6e-v7x defaults)
            # so 2k-4k row blocks fit; 48 MiB is still < v7x's 64 MiB/TC.
            vmem_limit_bytes=48 * 1024 * 1024),
    )(xp, *weight_args)

    if Bp != B or Tp != T:
        out = out[:B, :T]
    return out


# ---------------- parameter handling ----------------------------------------
def init_params(key):
    ks = jax.random.split(key, 8)
    std = 0.02
    return {
        "ln1_w": jnp.ones((1, N_EMBD), jnp.float32),
        "ln1_b": jnp.zeros((1, N_EMBD), jnp.float32),
        "ln2_w": jnp.ones((1, N_EMBD), jnp.float32),
        "ln2_b": jnp.zeros((1, N_EMBD), jnp.float32),
        # per-head K/Q/V weights concatenated along the output dim: (C, n_head*head_size)
        "wq": std * jax.random.normal(ks[0], (N_EMBD, N_EMBD), jnp.float32),
        "wk": std * jax.random.normal(ks[1], (N_EMBD, N_EMBD), jnp.float32),
        "wv": std * jax.random.normal(ks[2], (N_EMBD, N_EMBD), jnp.float32),
        "wp": std * jax.random.normal(ks[3], (N_EMBD, N_EMBD), jnp.float32),
        "bp": std * jax.random.normal(ks[4], (1, N_EMBD), jnp.float32),
        "w1": std * jax.random.normal(ks[5], (N_EMBD, 4 * N_EMBD), jnp.float32),
        "b1": std * jax.random.normal(ks[6], (1, 4 * N_EMBD), jnp.float32),
        "w2": std * jax.random.normal(ks[7], (4 * N_EMBD, N_EMBD), jnp.float32),
        "b2": jnp.zeros((1, N_EMBD), jnp.float32),
    }


def pack_params(p):
    """One-time packing: fuse QKV (scale folded into Q), store the matmul
    weights as bf16 MXU operands, bundle the small LN/bias vectors into a
    single (8, 64) f32 slab."""
    scale = float(N_EMBD) ** -0.5   # PyTorch Head uses C**-0.5 with C = n_embd
    wqkv = jnp.concatenate([p["wq"] * scale, p["wk"], p["wv"]], axis=1)  # (C, 3C)
    vecs = jnp.concatenate(
        [p["ln1_w"], p["ln1_b"], p["ln2_w"], p["ln2_b"], p["bp"], p["b2"],
         jnp.zeros((2, N_EMBD), jnp.float32)], axis=0)                   # (8, C)
    return {
        "wqkv": wqkv.astype(jnp.bfloat16),
        "wproj": p["wp"].astype(jnp.bfloat16),
        "w1": p["w1"].astype(jnp.bfloat16),
        "w2": p["w2"].astype(jnp.bfloat16),
        "vecs": vecs,                 # f32: LN / bias math stays f32
        "b1": p["b1"],                # f32: added to the f32 accumulator
    }


# ---------------- pure-JAX reference (for a silent correctness check) -------
def reference_block(x, p):
    def ln(v, w, b):
        mu = jnp.mean(v, axis=-1, keepdims=True)
        var = jnp.mean((v - mu) ** 2, axis=-1, keepdims=True)
        return (v - mu) / jnp.sqrt(var + EPS) * w + b

    B, T, C = x.shape
    xn = ln(x, p["ln1_w"][0], p["ln1_b"][0])
    mask = jnp.tril(jnp.ones((T, T), bool))
    outs = []
    for h in range(N_HEAD):
        s = h * HEAD_SIZE
        q = xn @ p["wq"][:, s:s + HEAD_SIZE]
        k = xn @ p["wk"][:, s:s + HEAD_SIZE]
        v = xn @ p["wv"][:, s:s + HEAD_SIZE]
        wei = q @ jnp.swapaxes(k, -2, -1) * (C ** -0.5)
        wei = jnp.where(mask, wei, -jnp.inf)
        wei = jax.nn.softmax(wei, axis=-1)
        outs.append(wei @ v)
    sa = jnp.concatenate(outs, axis=-1) @ p["wp"] + p["bp"][0]
    x = x + sa
    yn = ln(x, p["ln2_w"][0], p["ln2_b"][0])
    ff = jnp.maximum(yn @ p["w1"] + p["b1"][0], 0.0) @ p["w2"] + p["b2"][0]
    return x + ff


if __name__ == "__main__":
    key = jax.random.PRNGKey(0)
    kx, kx2, kp = jax.random.split(key, 3)
    params = init_params(kp)
    packed = pack_params(params)          # done once, outside the call path

    # Primary small-shape check (B=2, T=8).
    B, T = 2, 8
    x = jax.random.normal(kx, (B, T, N_EMBD), jnp.float32)
    out = jax.block_until_ready(transformer_block(x, packed))
    ref = reference_block(x, params)
    assert out.shape == (B, T, N_EMBD)
    # tolerance covers bf16 MXU operands (~1e-3) + approx EUP reciprocal in
    # the softmax denominator; reference is full f32.
    assert jnp.allclose(out, ref, atol=5e-3, rtol=5e-3), "mismatch vs JAX reference"

    # Awkward shape (prime B, T not a multiple of 8) exercises the wrapper's
    # ragged-block padding path.
    B2, T2 = 3, 12
    x2 = jax.random.normal(kx2, (B2, T2, N_EMBD), jnp.float32)
    out2 = jax.block_until_ready(transformer_block(x2, packed))
    ref2 = reference_block(x2, params)
    assert out2.shape == (B2, T2, N_EMBD)
    assert jnp.allclose(out2, ref2, atol=5e-3, rtol=5e-3), "mismatch (padded path)"

    print("KERNEL_OK")
</pallas_src>

<mosaic_0001>
module attributes {stable_mosaic.version = 11 : i64} {
  func.func @block_kernel(%arg0: i32, %arg1: memref<2x8x64xf32, #tpu.memory_space<vmem>>, %arg2: memref<64x192xbf16, #tpu.memory_space<vmem>>, %arg3: memref<64x64xbf16, #tpu.memory_space<vmem>>, %arg4: memref<64x256xbf16, #tpu.memory_space<vmem>>, %arg5: memref<256x64xbf16, #tpu.memory_space<vmem>>, %arg6: memref<8x64xf32, #tpu.memory_space<vmem>>, %arg7: memref<1x256xf32, #tpu.memory_space<vmem>>, %arg8: memref<2x8x64xf32, #tpu.memory_space<vmem>>) attributes {dimension_semantics = [#tpu.dimension_semantics<parallel>], iteration_bounds = array<i64: 1>, scalar_prefetch = 0 : i64, scratch_operands = 0 : i64, tpu.core_type = #tpu.core_type<tc>, window_params = [{transform_indices = @transform_0, window_bounds = array<i64: 2, 8, 64>}, {pipeline_mode = #tpu.pipeline_mode<synchronous>, transform_indices = @transform_1, window_bounds = array<i64: 64, 192>}, {pipeline_mode = #tpu.pipeline_mode<synchronous>, transform_indices = @transform_2, window_bounds = array<i64: 64, 64>}, {pipeline_mode = #tpu.pipeline_mode<synchronous>, transform_indices = @transform_3, window_bounds = array<i64: 64, 256>}, {pipeline_mode = #tpu.pipeline_mode<synchronous>, transform_indices = @transform_4, window_bounds = array<i64: 256, 64>}, {pipeline_mode = #tpu.pipeline_mode<synchronous>, transform_indices = @transform_5, window_bounds = array<i64: 8, 64>}, {pipeline_mode = #tpu.pipeline_mode<synchronous>, transform_indices = @transform_6, window_bounds = array<i64: 1, 256>}, {transform_indices = @transform_7, window_bounds = array<i64: 2, 8, 64>}]} {
    %c0 = arith.constant 0 : index
    %c0_0 = arith.constant 0 : index
    %c0_1 = arith.constant 0 : index
    %0 = vector.load %arg1[%c0, %c0_0, %c0_1] : memref<2x8x64xf32, #tpu.memory_space<vmem>>, vector<2x8x64xf32>
    %1 = vector.shape_cast %0 : vector<2x8x64xf32> to vector<16x64xf32>
    %c0_2 = arith.constant 0 : index
    %c0_3 = arith.constant 0 : index
    %2 = vector.load %arg6[%c0_2, %c0_3] : memref<8x64xf32, #tpu.memory_space<vmem>>, vector<1x64xf32>
    %c1 = arith.constant 1 : index
    %c0_4 = arith.constant 0 : index
    %3 = vector.load %arg6[%c1, %c0_4] : memref<8x64xf32, #tpu.memory_space<vmem>>, vector<1x64xf32>
    %c2 = arith.constant 2 : index
    %c0_5 = arith.constant 0 : index
    %4 = vector.load %arg6[%c2, %c0_5] : memref<8x64xf32, #tpu.memory_space<vmem>>, vector<1x64xf32>
    %c3 = arith.constant 3 : index
    %c0_6 = arith.constant 0 : index
    %5 = vector.load %arg6[%c3, %c0_6] : memref<8x64xf32, #tpu.memory_space<vmem>>, vector<1x64xf32>
    %c4 = arith.constant 4 : index
    %c0_7 = arith.constant 0 : index
    %6 = vector.load %arg6[%c4, %c0_7] : memref<8x64xf32, #tpu.memory_space<vmem>>, vector<1x64xf32>
    %c5 = arith.constant 5 : index
    %c0_8 = arith.constant 0 : index
    %7 = vector.load %arg6[%c5, %c0_8] : memref<8x64xf32, #tpu.memory_space<vmem>>, vector<1x64xf32>
    %cst = arith.constant dense<0.000000e+00> : vector<16xf32>
    %8 = vector.multi_reduction <add>, %1, %cst [1] : vector<16x64xf32> to vector<16xf32>
    %9 = vector.shape_cast %8 : vector<16xf32> to vector<16x1xf32>
    %cst_9 = arith.constant 6.400000e+01 : f32
    %10 = vector.broadcast %cst_9 : f32 to vector<16x1xf32>
    %11 = arith.divf %9, %10 : vector<16x1xf32>
    %12 = vector.broadcast %11 : vector<16x1xf32> to vector<16x64xf32>
    %13 = arith.subf %1, %12 : vector<16x64xf32>
    %14 = arith.mulf %13, %13 : vector<16x64xf32>
    %cst_10 = arith.constant dense<0.000000e+00> : vector<16xf32>
    %15 = vector.multi_reduction <add>, %14, %cst_10 [1] : vector<16x64xf32> to vector<16xf32>
    %16 = vector.shape_cast %15 : vector<16xf32> to vector<16x1xf32>
    %cst_11 = arith.constant 6.400000e+01 : f32
    %17 = vector.broadcast %cst_11 : f32 to vector<16x1xf32>
    %18 = arith.divf %16, %17 : vector<16x1xf32>
    %cst_12 = arith.constant 9.99999974E-6 : f32
    %19 = vector.broadcast %cst_12 : f32 to vector<16x1xf32>
    %20 = arith.addf %18, %19 : vector<16x1xf32>
    %21 = math.rsqrt %20 : vector<16x1xf32>
    %22 = vector.broadcast %21 : vector<16x1xf32> to vector<16x64xf32>
    %23 = arith.mulf %13, %22 : vector<16x64xf32>
    %24 = vector.broadcast %2 : vector<1x64xf32> to vector<16x64xf32>
    %25 = arith.mulf %23, %24 : vector<16x64xf32>
    %26 = vector.broadcast %3 : vector<1x64xf32> to vector<16x64xf32>
    %27 = arith.addf %25, %26 : vector<16x64xf32>
    %28 = arith.truncf %27 : vector<16x64xf32> to vector<16x64xbf16>
    %c0_13 = arith.constant 0 : index
    %c0_14 = arith.constant 0 : index
    %29 = vector.load %arg2[%c0_13, %c0_14] : memref<64x192xbf16, #tpu.memory_space<vmem>>, vector<64x192xbf16>
    %cst_15 = arith.constant dense<0.000000e+00> : vector<16x192xf32>
    %30 = tpu.matmul %28, %29, %cst_15 {dimension_numbers = #tpu.dot_dimension_numbers<[1], [0], [0], [1], [0, 0, 1, 1], [], []>} : vector<16x64xbf16>, vector<64x192xbf16>, vector<16x192xf32> -> vector<16x192xf32>
    %31 = vector.shape_cast %30 : vector<16x192xf32> to vector<2x8x192xf32>
    %32 = tpu.iota {dimensions = array<i32: 0>} : vector<8x8xi32>
    %33 = tpu.iota {dimensions = array<i32: 1>} : vector<8x8xi32>
    %34 = arith.cmpi sge, %32, %33 : vector<8x8xi32>
    %35 = vector.shape_cast %34 : vector<8x8xi1> to vector<1x8x8xi1>
    %cst_16 = arith.constant 0.000000e+00 : f32
    %36 = vector.broadcast %cst_16 : f32 to vector<16x64xf32>
    %37 = vector.extract_strided_slice %31 {offsets = [0, 0, 0], sizes = [2, 8, 16], strides = [1, 1, 1]} : vector<2x8x192xf32> to vector<2x8x16xf32>
    %38 = vector.extract_strided_slice %31 {offsets = [0, 0, 64], sizes = [2, 8, 16], strides = [1, 1, 1]} : vector<2x8x192xf32> to vector<2x8x16xf32>
    %39 = vector.extract_strided_slice %31 {offsets = [0, 0, 128], sizes = [2, 8, 16], strides = [1, 1, 1]} : vector<2x8x192xf32> to vector<2x8x16xf32>
    %40 = arith.truncf %37 : vector<2x8x16xf32> to vector<2x8x16xbf16>
    %41 = arith.truncf %38 : vector<2x8x16xf32> to vector<2x8x16xbf16>
    "tpu.trace_start"() <{level = 10 : i32, message = "btd,bsd->bts"}> : () -> ()
    %cst_17 = arith.constant dense<0.000000e+00> : vector<2x8x8xf32>
    %42 = tpu.matmul %40, %41, %cst_17 {dimension_numbers = #tpu.dot_dimension_numbers<[2], [2], [1], [1], [0, 0, 0, 1, 1, 1], [0], [0]>} : vector<2x8x16xbf16>, vector<2x8x16xbf16>, vector<2x8x8xf32> -> vector<2x8x8xf32>
    %cst_18 = arith.constant -1.000000e+30 : f32
    "tpu.trace_stop"() : () -> ()
    %43 = vector.shape_cast %35 : vector<1x8x8xi1> to vector<1x8x8xi1>
    %44 = vector.broadcast %43 : vector<1x8x8xi1> to vector<2x8x8xi1>
    %45 = vector.broadcast %cst_18 : f32 to vector<2x8x8xf32>
    %46 = arith.select %44, %42, %45 : vector<2x8x8xi1>, vector<2x8x8xf32>
    %cst_19 = arith.constant dense<0xFF800000> : vector<2x8xf32>
    %47 = vector.multi_reduction <maximumf>, %46, %cst_19 [2] : vector<2x8x8xf32> to vector<2x8xf32>
    %48 = vector.shape_cast %47 : vector<2x8xf32> to vector<2x8x1xf32>
    %49 = vector.broadcast %48 : vector<2x8x1xf32> to vector<2x8x8xf32>
    %50 = arith.subf %46, %49 : vector<2x8x8xf32>
    %51 = math.exp %50 : vector<2x8x8xf32>
    %cst_20 = arith.constant dense<0.000000e+00> : vector<2x8xf32>
    %52 = vector.multi_reduction <add>, %51, %cst_20 [2] : vector<2x8x8xf32> to vector<2x8xf32>
    %53 = vector.shape_cast %52 : vector<2x8xf32> to vector<2x8x1xf32>
    %54 = tpu.reciprocal %53 {approx = true} : vector<2x8x1xf32> -> vector<2x8x1xf32>
    %55 = vector.broadcast %54 : vector<2x8x1xf32> to vector<2x8x8xf32>
    %56 = arith.mulf %51, %55 : vector<2x8x8xf32>
    %57 = arith.truncf %56 : vector<2x8x8xf32> to vector<2x8x8xbf16>
    %58 = arith.truncf %39 : vector<2x8x16xf32> to vector<2x8x16xbf16>
    "tpu.trace_start"() <{level = 10 : i32, message = "bts,bsd->btd"}> : () -> ()
    %cst_21 = arith.constant dense<0.000000e+00> : vector<2x8x16xf32>
    %59 = tpu.matmul %57, %58, %cst_21 {dimension_numbers = #tpu.dot_dimension_numbers<[2], [1], [1], [2], [0, 0, 0, 1, 1, 2], [0], [0]>} : vector<2x8x8xbf16>, vector<2x8x16xbf16>, vector<2x8x16xf32> -> vector<2x8x16xf32>
    "tpu.trace_stop"() : () -> ()
    %60 = vector.shape_cast %59 : vector<2x8x16xf32> to vector<16x16xf32>
    %61 = arith.truncf %60 : vector<16x16xf32> to vector<16x16xbf16>
    %c0_22 = arith.constant 0 : index
    %c0_23 = arith.constant 0 : index
    %62 = vector.load %arg3[%c0_22, %c0_23] : memref<64x64xbf16, #tpu.memory_space<vmem>>, vector<16x64xbf16>
    %cst_24 = arith.constant dense<0.000000e+00> : vector<16x64xf32>
    %63 = tpu.matmul %61, %62, %cst_24 {dimension_numbers = #tpu.dot_dimension_numbers<[1], [0], [0], [1], [0, 0, 1, 1], [], []>} : vector<16x16xbf16>, vector<16x64xbf16>, vector<16x64xf32> -> vector<16x64xf32>
    %64 = arith.addf %36, %63 : vector<16x64xf32>
    %65 = vector.extract_strided_slice %31 {offsets = [0, 0, 16], sizes = [2, 8, 16], strides = [1, 1, 1]} : vector<2x8x192xf32> to vector<2x8x16xf32>
    %66 = vector.extract_strided_slice %31 {offsets = [0, 0, 80], sizes = [2, 8, 16], strides = [1, 1, 1]} : vector<2x8x192xf32> to vector<2x8x16xf32>
    %67 = vector.extract_strided_slice %31 {offsets = [0, 0, 144], sizes = [2, 8, 16], strides = [1, 1, 1]} : vector<2x8x192xf32> to vector<2x8x16xf32>
    %68 = arith.truncf %65 : vector<2x8x16xf32> to vector<2x8x16xbf16>
    %69 = arith.truncf %66 : vector<2x8x16xf32> to vector<2x8x16xbf16>
    "tpu.trace_start"() <{level = 10 : i32, message = "btd,bsd->bts"}> : () -> ()
    %cst_25 = arith.constant dense<0.000000e+00> : vector<2x8x8xf32>
    %70 = tpu.matmul %68, %69, %cst_25 {dimension_numbers = #tpu.dot_dimension_numbers<[2], [2], [1], [1], [0, 0, 0, 1, 1, 1], [0], [0]>} : vector<2x8x16xbf16>, vector<2x8x16xbf16>, vector<2x8x8xf32> -> vector<2x8x8xf32>
    %cst_26 = arith.constant -1.000000e+30 : f32
    "tpu.trace_stop"() : () -> ()
    %71 = vector.shape_cast %35 : vector<1x8x8xi1> to vector<1x8x8xi1>
    %72 = vector.broadcast %71 : vector<1x8x8xi1> to vector<2x8x8xi1>
    %73 = vector.broadcast %cst_26 : f32 to vector<2x8x8xf32>
    %74 = arith.select %72, %70, %73 : vector<2x8x8xi1>, vector<2x8x8xf32>
    %cst_27 = arith.constant dense<0xFF800000> : vector<2x8xf32>
    %75 = vector.multi_reduction <maximumf>, %74, %cst_27 [2] : vector<2x8x8xf32> to vector<2x8xf32>
    %76 = vector.shape_cast %75 : vector<2x8xf32> to vector<2x8x1xf32>
    %77 = vector.broadcast %76 : vector<2x8x1xf32> to vector<2x8x8xf32>
    %78 = arith.subf %74, %77 : vector<2x8x8xf32>
    %79 = math.exp %78 : vector<2x8x8xf32>
    %cst_28 = arith.constant dense<0.000000e+00> : vector<2x8xf32>
    %80 = vector.multi_reduction <add>, %79, %cst_28 [2] : vector<2x8x8xf32> to vector<2x8xf32>
    %81 = vector.shape_cast %80 : vector<2x8xf32> to vector<2x8x1xf32>
    %82 = tpu.reciprocal %81 {approx = true} : vector<2x8x1xf32> -> vector<2x8x1xf32>
    %83 = vector.broadcast %82 : vector<2x8x1xf32> to vector<2x8x8xf32>
    %84 = arith.mulf %79, %83 : vector<2x8x8xf32>
    %85 = arith.truncf %84 : vector<2x8x8xf32> to vector<2x8x8xbf16>
    %86 = arith.truncf %67 : vector<2x8x16xf32> to vector<2x8x16xbf16>
    "tpu.trace_start"() <{level = 10 : i32, message = "bts,bsd->btd"}> : () -> ()
    %cst_29 = arith.constant dense<0.000000e+00> : vector<2x8x16xf32>
    %87 = tpu.matmul %85, %86, %cst_29 {dimension_numbers = #tpu.dot_dimension_numbers<[2], [1], [1], [2], [0, 0, 0, 1, 1, 2], [0], [0]>} : vector<2x8x8xbf16>, vector<2x8x16xbf16>, vector<2x8x16xf32> -> vector<2x8x16xf32>
    "tpu.trace_stop"() : () -> ()
    %88 = vector.shape_cast %87 : vector<2x8x16xf32> to vector<16x16xf32>
    %89 = arith.truncf %88 : vector<16x16xf32> to vector<16x16xbf16>
    %c16 = arith.constant 16 : index
    %c0_30 = arith.constant 0 : index
    %90 = vector.load %arg3[%c16, %c0_30] : memref<64x64xbf16, #tpu.memory_space<vmem>>, vector<16x64xbf16>
    %cst_31 = arith.constant dense<0.000000e+00> : vector<16x64xf32>
    %91 = tpu.matmul %89, %90, %cst_31 {dimension_numbers = #tpu.dot_dimension_numbers<[1], [0], [0], [1], [0, 0, 1, 1], [], []>} : vector<16x16xbf16>, vector<16x64xbf16>, vector<16x64xf32> -> vector<16x64xf32>
    %92 = arith.addf %64, %91 : vector<16x64xf32>
    %93 = vector.extract_strided_slice %31 {offsets = [0, 0, 32], sizes = [2, 8, 16], strides = [1, 1, 1]} : vector<2x8x192xf32> to vector<2x8x16xf32>
    %94 = vector.extract_strided_slice %31 {offsets = [0, 0, 96], sizes = [2, 8, 16], strides = [1, 1, 1]} : vector<2x8x192xf32> to vector<2x8x16xf32>
    %95 = vector.extract_strided_slice %31 {offsets = [0, 0, 160], sizes = [2, 8, 16], strides = [1, 1, 1]} : vector<2x8x192xf32> to vector<2x8x16xf32>
    %96 = arith.truncf %93 : vector<2x8x16xf32> to vector<2x8x16xbf16>
    %97 = arith.truncf %94 : vector<2x8x16xf32> to vector<2x8x16xbf16>
    "tpu.trace_start"() <{level = 10 : i32, message = "btd,bsd->bts"}> : () -> ()
    %cst_32 = arith.constant dense<0.000000e+00> : vector<2x8x8xf32>
    %98 = tpu.matmul %96, %97, %cst_32 {dimension_numbers = #tpu.dot_dimension_numbers<[2], [2], [1], [1], [0, 0, 0, 1, 1, 1], [0], [0]>} : vector<2x8x16xbf16>, vector<2x8x16xbf16>, vector<2x8x8xf32> -> vector<2x8x8xf32>
    %cst_33 = arith.constant -1.000000e+30 : f32
    "tpu.trace_stop"() : () -> ()
    %99 = vector.shape_cast %35 : vector<1x8x8xi1> to vector<1x8x8xi1>
    %100 = vector.broadcast %99 : vector<1x8x8xi1> to vector<2x8x8xi1>
    %101 = vector.broadcast %cst_33 : f32 to vector<2x8x8xf32>
    %102 = arith.select %100, %98, %101 : vector<2x8x8xi1>, vector<2x8x8xf32>
    %cst_34 = arith.constant dense<0xFF800000> : vector<2x8xf32>
    %103 = vector.multi_reduction <maximumf>, %102, %cst_34 [2] : vector<2x8x8xf32> to vector<2x8xf32>
    %104 = vector.shape_cast %103 : vector<2x8xf32> to vector<2x8x1xf32>
    %105 = vector.broadcast %104 : vector<2x8x1xf32> to vector<2x8x8xf32>
    %106 = arith.subf %102, %105 : vector<2x8x8xf32>
    %107 = math.exp %106 : vector<2x8x8xf32>
    %cst_35 = arith.constant dense<0.000000e+00> : vector<2x8xf32>
    %108 = vector.multi_reduction <add>, %107, %cst_35 [2] : vector<2x8x8xf32> to vector<2x8xf32>
    %109 = vector.shape_cast %108 : vector<2x8xf32> to vector<2x8x1xf32>
    %110 = tpu.reciprocal %109 {approx = true} : vector<2x8x1xf32> -> vector<2x8x1xf32>
    %111 = vector.broadcast %110 : vector<2x8x1xf32> to vector<2x8x8xf32>
    %112 = arith.mulf %107, %111 : vector<2x8x8xf32>
    %113 = arith.truncf %112 : vector<2x8x8xf32> to vector<2x8x8xbf16>
    %114 = arith.truncf %95 : vector<2x8x16xf32> to vector<2x8x16xbf16>
    "tpu.trace_start"() <{level = 10 : i32, message = "bts,bsd->btd"}> : () -> ()
    %cst_36 = arith.constant dense<0.000000e+00> : vector<2x8x16xf32>
    %115 = tpu.matmul %113, %114, %cst_36 {dimension_numbers = #tpu.dot_dimension_numbers<[2], [1], [1], [2], [0, 0, 0, 1, 1, 2], [0], [0]>} : vector<2x8x8xbf16>, vector<2x8x16xbf16>, vector<2x8x16xf32> -> vector<2x8x16xf32>
    "tpu.trace_stop"() : () -> ()
    %116 = vector.shape_cast %115 : vector<2x8x16xf32> to vector<16x16xf32>
    %117 = arith.truncf %116 : vector<16x16xf32> to vector<16x16xbf16>
    %c32 = arith.constant 32 : index
    %c0_37 = arith.constant 0 : index
    %118 = vector.load %arg3[%c32, %c0_37] : memref<64x64xbf16, #tpu.memory_space<vmem>>, vector<16x64xbf16>
    %cst_38 = arith.constant dense<0.000000e+00> : vector<16x64xf32>
    %119 = tpu.matmul %117, %118, %cst_38 {dimension_numbers = #tpu.dot_dimension_numbers<[1], [0], [0], [1], [0, 0, 1, 1], [], []>} : vector<16x16xbf16>, vector<16x64xbf16>, vector<16x64xf32> -> vector<16x64xf32>
    %120 = arith.addf %92, %119 : vector<16x64xf32>
    %121 = vector.extract_strided_slice %31 {offsets = [0, 0, 48], sizes = [2, 8, 16], strides = [1, 1, 1]} : vector<2x8x192xf32> to vector<2x8x16xf32>
    %122 = vector.extract_strided_slice %31 {offsets = [0, 0, 112], sizes = [2, 8, 16], strides = [1, 1, 1]} : vector<2x8x192xf32> to vector<2x8x16xf32>
    %123 = vector.extract_strided_slice %31 {offsets = [0, 0, 176], sizes = [2, 8, 16], strides = [1, 1, 1]} : vector<2x8x192xf32> to vector<2x8x16xf32>
    %124 = arith.truncf %121 : vector<2x8x16xf32> to vector<2x8x16xbf16>
    %125 = arith.truncf %122 : vector<2x8x16xf32> to vector<2x8x16xbf16>
    "tpu.trace_start"() <{level = 10 : i32, message = "btd,bsd->bts"}> : () -> ()
    %cst_39 = arith.constant dense<0.000000e+00> : vector<2x8x8xf32>
    %126 = tpu.matmul %124, %125, %cst_39 {dimension_numbers = #tpu.dot_dimension_numbers<[2], [2], [1], [1], [0, 0, 0, 1, 1, 1], [0], [0]>} : vector<2x8x16xbf16>, vector<2x8x16xbf16>, vector<2x8x8xf32> -> vector<2x8x8xf32>
    %cst_40 = arith.constant -1.000000e+30 : f32
    "tpu.trace_stop"() : () -> ()
    %127 = vector.shape_cast %35 : vector<1x8x8xi1> to vector<1x8x8xi1>
    %128 = vector.broadcast %127 : vector<1x8x8xi1> to vector<2x8x8xi1>
    %129 = vector.broadcast %cst_40 : f32 to vector<2x8x8xf32>
    %130 = arith.select %128, %126, %129 : vector<2x8x8xi1>, vector<2x8x8xf32>
    %cst_41 = arith.constant dense<0xFF800000> : vector<2x8xf32>
    %131 = vector.multi_reduction <maximumf>, %130, %cst_41 [2] : vector<2x8x8xf32> to vector<2x8xf32>
    %132 = vector.shape_cast %131 : vector<2x8xf32> to vector<2x8x1xf32>
    %133 = vector.broadcast %132 : vector<2x8x1xf32> to vector<2x8x8xf32>
    %134 = arith.subf %130, %133 : vector<2x8x8xf32>
    %135 = math.exp %134 : vector<2x8x8xf32>
    %cst_42 = arith.constant dense<0.000000e+00> : vector<2x8xf32>
    %136 = vector.multi_reduction <add>, %135, %cst_42 [2] : vector<2x8x8xf32> to vector<2x8xf32>
    %137 = vector.shape_cast %136 : vector<2x8xf32> to vector<2x8x1xf32>
    %138 = tpu.reciprocal %137 {approx = true} : vector<2x8x1xf32> -> vector<2x8x1xf32>
    %139 = vector.broadcast %138 : vector<2x8x1xf32> to vector<2x8x8xf32>
    %140 = arith.mulf %135, %139 : vector<2x8x8xf32>
    %141 = arith.truncf %140 : vector<2x8x8xf32> to vector<2x8x8xbf16>
    %142 = arith.truncf %123 : vector<2x8x16xf32> to vector<2x8x16xbf16>
    "tpu.trace_start"() <{level = 10 : i32, message = "bts,bsd->btd"}> : () -> ()
    %cst_43 = arith.constant dense<0.000000e+00> : vector<2x8x16xf32>
    %143 = tpu.matmul %141, %142, %cst_43 {dimension_numbers = #tpu.dot_dimension_numbers<[2], [1], [1], [2], [0, 0, 0, 1, 1, 2], [0], [0]>} : vector<2x8x8xbf16>, vector<2x8x16xbf16>, vector<2x8x16xf32> -> vector<2x8x16xf32>
    "tpu.trace_stop"() : () -> ()
    %144 = vector.shape_cast %143 : vector<2x8x16xf32> to vector<16x16xf32>
    %145 = arith.truncf %144 : vector<16x16xf32> to vector<16x16xbf16>
    %c48 = arith.constant 48 : index
    %c0_44 = arith.constant 0 : index
    %146 = vector.load %arg3[%c48, %c0_44] : memref<64x64xbf16, #tpu.memory_space<vmem>>, vector<16x64xbf16>
    %cst_45 = arith.constant dense<0.000000e+00> : vector<16x64xf32>
    %147 = tpu.matmul %145, %146, %cst_45 {dimension_numbers = #tpu.dot_dimension_numbers<[1], [0], [0], [1], [0, 0, 1, 1], [], []>} : vector<16x16xbf16>, vector<16x64xbf16>, vector<16x64xf32> -> vector<16x64xf32>
    %148 = arith.addf %120, %147 : vector<16x64xf32>
    %149 = arith.addf %1, %148 : vector<16x64xf32>
    %150 = vector.broadcast %6 : vector<1x64xf32> to vector<16x64xf32>
    %151 = arith.addf %149, %150 : vector<16x64xf32>
    %cst_46 = arith.constant dense<0.000000e+00> : vector<16xf32>
    %152 = vector.multi_reduction <add>, %151, %cst_46 [1] : vector<16x64xf32> to vector<16xf32>
    %153 = vector.shape_cast %152 : vector<16xf32> to vector<16x1xf32>
    %cst_47 = arith.constant 6.400000e+01 : f32
    %154 = vector.broadcast %cst_47 : f32 to vector<16x1xf32>
    %155 = arith.divf %153, %154 : vector<16x1xf32>
    %156 = vector.broadcast %155 : vector<16x1xf32> to vector<16x64xf32>
    %157 = arith.subf %151, %156 : vector<16x64xf32>
    %158 = arith.mulf %157, %157 : vector<16x64xf32>
    %cst_48 = arith.constant dense<0.000000e+00> : vector<16xf32>
    %159 = vector.multi_reduction <add>, %158, %cst_48 [1] : vector<16x64xf32> to vector<16xf32>
    %160 = vector.shape_cast %159 : vector<16xf32> to vector<16x1xf32>
    %cst_49 = arith.constant 6.400000e+01 : f32
    %161 = vector.broadcast %cst_49 : f32 to vector<16x1xf32>
    %162 = arith.divf %160, %161 : vector<16x1xf32>
    %cst_50 = arith.constant 9.99999974E-6 : f32
    %163 = vector.broadcast %cst_50 : f32 to vector<16x1xf32>
    %164 = arith.addf %162, %163 : vector<16x1xf32>
    %165 = math.rsqrt %164 : vector<16x1xf32>
    %166 = vector.broadcast %165 : vector<16x1xf32> to vector<16x64xf32>
    %167 = arith.mulf %157, %166 : vector<16x64xf32>
    %168 = vector.broadcast %4 : vector<1x64xf32> to vector<16x64xf32>
    %169 = arith.mulf %167, %168 : vector<16x64xf32>
    %170 = vector.broadcast %5 : vector<1x64xf32> to vector<16x64xf32>
    %171 = arith.addf %169, %170 : vector<16x64xf32>
    %172 = arith.truncf %171 : vector<16x64xf32> to vector<16x64xbf16>
    %c0_51 = arith.constant 0 : index
    %c0_52 = arith.constant 0 : index
    %173 = vector.load %arg4[%c0_51, %c0_52] : memref<64x256xbf16, #tpu.memory_space<vmem>>, vector<64x256xbf16>
    %cst_53 = arith.constant dense<0.000000e+00> : vector<16x256xf32>
    %174 = tpu.matmul %172, %173, %cst_53 {dimension_numbers = #tpu.dot_dimension_numbers<[1], [0], [0], [1], [0, 0, 1, 1], [], []>} : vector<16x64xbf16>, vector<64x256xbf16>, vector<16x256xf32> -> vector<16x256xf32>
    %c0_54 = arith.constant 0 : index
    %c0_55 = arith.constant 0 : index
    %175 = vector.load %arg7[%c0_54, %c0_55] : memref<1x256xf32, #tpu.memory_space<vmem>>, vector<1x256xf32>
    %176 = vector.broadcast %175 : vector<1x256xf32> to vector<16x256xf32>
    %177 = arith.addf %174, %176 : vector<16x256xf32>
    %cst_56 = arith.constant 0.000000e+00 : f32
    %178 = vector.broadcast %cst_56 : f32 to vector<16x256xf32>
    %179 = arith.maximumf %177, %178 : vector<16x256xf32>
    %180 = arith.truncf %179 : vector<16x256xf32> to vector<16x256xbf16>
    %c0_57 = arith.constant 0 : index
    %c0_58 = arith.constant 0 : index
    %181 = vector.load %arg5[%c0_57, %c0_58] : memref<256x64xbf16, #tpu.memory_space<vmem>>, vector<256x64xbf16>
    %cst_59 = arith.constant dense<0.000000e+00> : vector<16x64xf32>
    %182 = tpu.matmul %180, %181, %cst_59 {dimension_numbers = #tpu.dot_dimension_numbers<[1], [0], [0], [1], [0, 0, 1, 1], [], []>} : vector<16x256xbf16>, vector<256x64xbf16>, vector<16x64xf32> -> vector<16x64xf32>
    %183 = vector.broadcast %7 : vector<1x64xf32> to vector<16x64xf32>
    %184 = arith.addf %182, %183 : vector<16x64xf32>
    %185 = arith.addf %151, %184 : vector<16x64xf32>
    %186 = vector.shape_cast %185 : vector<16x64xf32> to vector<2x8x64xf32>
    %c0_60 = arith.constant 0 : index
    %c0_61 = arith.constant 0 : index
    %c0_62 = arith.constant 0 : index
    %187 = vector.load %arg8[%c0_60, %c0_61, %c0_62] : memref<2x8x64xf32, #tpu.memory_space<vmem>>, vector<2x8x64xf32>
    tpu.vector_store %arg8[%c0_60, %c0_61, %c0_62], %186 {strides = array<i32>} : memref<2x8x64xf32, #tpu.memory_space<vmem>>, vector<2x8x64xf32>,
    return
  }
  func.func @transform_0(%arg0: i32) -> (i32, i32, i32) {
    %c0_i32 = arith.constant 0 : i32
    %c0_i32_0 = arith.constant 0 : i32
    %c0_i32_1 = arith.constant 0 : i32
    return %arg0, %c0_i32, %c0_i32_0 : i32, i32, i32
  }
  func.func @transform_1(%arg0: i32) -> (i32, i32) {
    %c0_i32 = arith.constant 0 : i32
    %c0_i32_0 = arith.constant 0 : i32
    %c0_i32_1 = arith.constant 0 : i32
    return %c0_i32, %c0_i32_0 : i32, i32
  }
  func.func @transform_2(%arg0: i32) -> (i32, i32) {
    %c0_i32 = arith.constant 0 : i32
    %c0_i32_0 = arith.constant 0 : i32
    %c0_i32_1 = arith.constant 0 : i32
    return %c0_i32, %c0_i32_0 : i32, i32
  }
  func.func @transform_3(%arg0: i32) -> (i32, i32) {
    %c0_i32 = arith.constant 0 : i32
    %c0_i32_0 = arith.constant 0 : i32
    %c0_i32_1 = arith.constant 0 : i32
    return %c0_i32, %c0_i32_0 : i32, i32
  }
  func.func @transform_4(%arg0: i32) -> (i32, i32) {
    %c0_i32 = arith.constant 0 : i32
    %c0_i32_0 = arith.constant 0 : i32
    %c0_i32_1 = arith.constant 0 : i32
    return %c0_i32, %c0_i32_0 : i32, i32
  }
  func.func @transform_5(%arg0: i32) -> (i32, i32) {
    %c0_i32 = arith.constant 0 : i32
    %c0_i32_0 = arith.constant 0 : i32
    %c0_i32_1 = arith.constant 0 : i32
    return %c0_i32, %c0_i32_0 : i32, i32
  }
  func.func @transform_6(%arg0: i32) -> (i32, i32) {
    %c0_i32 = arith.constant 0 : i32
    %c0_i32_0 = arith.constant 0 : i32
    %c0_i32_1 = arith.constant 0 : i32
    return %c0_i32, %c0_i32_0 : i32, i32
  }
  func.func @transform_7(%arg0: i32) -> (i32, i32, i32) {
    %c0_i32 = arith.constant 0 : i32
    %c0_i32_0 = arith.constant 0 : i32
    %c0_i32_1 = arith.constant 0 : i32
    return %arg0, %c0_i32, %c0_i32_0 : i32, i32, i32
  }
}

</mosaic_0001>

<bundles_post_ra>
// kernel: tpu_custom_call.1
= control target key start
LH: loop header
LB: loop body
LE: loop exit
PB: predicated region body
PF: predicated region fallthrough
CT: control target
= control target key end

     0   :  { %vm36_vm0 = vcmask 523264   ;;  %s2434_s0 = inlined_call_operand.vmem [shape: f32[2,8,64], index: 0, kind: input, shape index: {}]   ;;  %s2435_s1 = inlined_call_operand.vmem [shape: bf16[64,192], index: 1, kind: input, shape index: {}]   ;;  %s2436_s2 = inlined_call_operand.vmem [shape: bf16[64,64], index: 2, kind: input, shape index: {}]   ;;  %s2437_s3 = inlined_call_operand.vmem [shape: bf16[64,256], index: 3, kind: input, shape index: {}]   ;;  %s2438_s4 = inlined_call_operand.vmem [shape: bf16[256,64], index: 4, kind: input, shape index: {}]   ;;  %s2439_s5 = inlined_call_operand.vmem [shape: f32[8,64], index: 5, kind: input, shape index: {}]   ;;  %s2440_s6 = inlined_call_operand.vmem [shape: f32[1,256], index: 6, kind: input, shape index: {}]   ;;  %s2441_s7 = inlined_call_operand.hbm [shape: f32[2,8,64], index: 7, kind: output, shape index: {}]  }
   0x1   :  { %v2060_v0 = vld [vmem:[%s2434_s0] sm:$0xff]  ;;  %v2065_v1 = vld [vmem:[%s2434_s0 + $0x8] sm:$0xff] }
   0x2   :  { %v37_v2 = vsel %vm36_vm0, %v2060_v0, 0.0  ;;  %v40_v3 = vsel %vm36_vm0, %v2065_v1, 0.0 }
   0x3   :  { %38 = vadd.xlane.f32.xlu0 %v37_v2 }
   0x7   :  { %41 = vadd.xlane.f32.xlu0 %v40_v3 }
   0x8   :  { %12 = vsyncpa [#allocation3], 0  ;;  %v1896_v14 = vld [vmem:[%s2435_s1 + $0x4] ss:$8 sps:$4 sm:$0xff]   ;;  %v1898_v15 = vld [vmem:[%s2435_s1] ss:$8 sps:$4 sm:$0xff]   ;;  %v171_v55 = vlaneseq }
   0x9   :  { %128 = vmatprep.subr.bf16.mxu0 %v1896_v14  ;;  %v1899_v16 = vld [vmem:[%s2435_s1 + $0x14] ss:$8 sps:$4 sm:$0xff]   ;;  %v1901_v17 = vld [vmem:[%s2435_s1 + $0x10] ss:$8 sps:$4 sm:$0xff]   ;;  %v1902_v18 = vld [vmem:[%s2435_s1 + $0x24] ss:$8 sps:$4 sm:$0xff]  }
   0xa   :  { %129 = vmatpush1.bf16.msra.mxu0 %v1898_v15  ;;  %v1904_v19 = vld [vmem:[%s2435_s1 + $0x20] ss:$8 sps:$4 sm:$0xff]   ;;  %v1905_v20 = vld [vmem:[%s2435_s1 + $0x34] ss:$8 sps:$4 sm:$0xff]   ;;  %v1907_v21 = vld [vmem:[%s2435_s1 + $0x30] ss:$8 sps:$4 sm:$0xff]  }
   0xb   :  { %130 = vmatprep.subr.bf16.mxu0 %v1899_v16  ;;  %v2004_v22 = vmov 0   ;;  %v1637_v31 = vld [vmem:[%s2439_s5] ss:$0 sm:$0xff]  ;;  %v1638_v35 = vld [vmem:[%s2439_s5 + $0x1] ss:$0 sm:$0xff]  ;;  %v2005_v40 = vmov 0.0  }
   0xc   :  { %160 = vmatprep.mubr.bf16.mxu0 %v2004_v22  ;;  %1769 = vmatprep.subr.bf16.mxu1 %v2005_v40  ;;  %vm2006_vm1 = vmmov 0   ;;  %s2007_s23 = smov 64   ;;  %vm181_vm2 = vcmask 130048   ;;  %vm311_vm3 = vcmask 1043456   ;;  %v2141_v56 = vshrl.u32 %v171_v55, 7  ;;  %s2008_s24 = smov 48  }
   0xd   :  { %1771 = vmatprep.mubr.msk.bf16.mxu1 %vm2006_vm1, %v2005_v40  ;;  %v174_v57 = vand.u32 127, %v171_v55  ;;  %vm281_vm5 = vcmask 64512   ;;  %s2009_s25 = smov 112   ;;  %s2010_s26 = smov 32  }
   0xe   :  { %131 = vmatpush1.bf16.msra.mxu0 %v1901_v17  ;;  %s2011_s27 = smov 96   ;;  %s2012_s8 = smov 16  }
   0xf   :  { %132 = vmatprep.subr.bf16.mxu0 %v1902_v18  ;;  %vm2144_vm4 = vcmp.ge.s32.totalorder %v2141_v56, %v174_v57  ;;  %s2013_s9 = smov 80  }
  0x12   :  { %133 = vmatpush1.bf16.msra.mxu0 %v1904_v19 }
  0x13   :  { %134 = vmatprep.subr.bf16.mxu0 %v1905_v20 }
  0x16   :  { %135 = vmatpush1.bf16.msra.mxu0 %v1907_v21 }
  0x17   :  { %1763 = vmatprep.subr.bf16.mxu0 %v2005_v40 }
  0x90   :  { %v39_v4 = vpop.xlane.xlu0 %38 }
  0x91   :  { %v44_v5 = vmul.f32 0.015625, %v39_v4 }
  0x93   :  { %v46_v6 = vsub.f32 %v2060_v0, %v44_v5 }
  0x94   :  { %v42_v7 = vpop.xlane.xlu0 %41 }
  0x95   :  { %v45_v8 = vmul.f32 0.015625, %v42_v7  ;;  %v48_v9 = vmul.f32 %v46_v6, %v46_v6 }
  0x97   :  { %v47_v10 = vsub.f32 %v2065_v1, %v45_v8  ;;  %v50_v11 = vsel %vm36_vm0, %v48_v9, 0.0 }
  0x98   :  { %51 = vadd.xlane.f32.xlu1 %v50_v11 }
  0x99   :  { %v49_v12 = vmul.f32 %v47_v10, %v47_v10 }
  0x9b   :  { %v53_v13 = vsel %vm36_vm0, %v49_v12, 0.0 }
  0x9c   :  { %54 = vadd.xlane.f32.xlu1 %v53_v13 }
 0x125   :  { %v52_v23 = vpop.xlane.xlu1 %51 }
 0x126   :  { %v56_v24 = vmul.f32 0.015625, %v52_v23 }
 0x128   :  { %v58_v25 = vadd.f32 1e-05, %v56_v24 }
 0x129   :  { %v55_v26 = vpop.xlane.xlu1 %54 }
 0x12a   :  { %1940 = vrsqrt.f32 %v58_v25  ;;  %v57_v27 = vmul.f32 0.015625, %v55_v26 }
 0x12c   :  { %v59_v28 = vadd.f32 1e-05, %v57_v27 }
 0x12e   :  { %1942 = vrsqrt.f32 %v59_v28 }
 0x134   :  { %v1941_v29 = vpop.eup %1940 }
 0x135   :  { %v62_v30 = vmul.f32 %v1941_v29, %v46_v6 }
 0x137   :  { %v68_v34 = vmul.f32 %v1637_v31, %v62_v30 }
 0x138   :  { %v1943_v32 = vpop.eup %1942 }
 0x139   :  { %v63_v33 = vmul.f32 %v1943_v32, %v47_v10  ;;  %v74_v37 = vadd.f32 %v1638_v35, %v68_v34 }
 0x13b   :  { %v69_v36 = vmul.f32 %v1637_v31, %v63_v33 }
 0x13d   :  { %v75_v38 = vadd.f32 %v1638_v35, %v69_v36 }
 0x13f   :  { %v76_v39 = vpack.c.bf16 %v75_v38, %v74_v37 }
 0x141   :  { %1647 = vmatmul.mubr.msk.bf16.vlgmr.msra.gmra.mrb[0].mxu0 %vm36_vm0, %v76_v39 }
 0x142   :  { %1765 = vmatprep.mubr.msk.bf16.mxu0 %vm2006_vm1, %v2005_v40 }
 0x214   :  { %v162_v41 = vpop.f32.mrb[0].mxu0 }
 0x215   :  { %v2113_v42 = vpack.c.bf16 %v162_v41, %v162_v41  ;;  %v164_v43 = vpop.f32.mrb[1].mxu0 }
 0x216   :  { %v166_v44 = vpop.f32.mrb[2].mxu0  ;;  %v2122_v51 = vpack.c.bf16 %v164_v43, %v164_v43 }
 0x217   :  { %v2115_v45 = vpack.c.bf16 %v166_v44, %v166_v44  ;;  %179 = vrot.lane.b32.xlu0 %v2113_v42, %s2007_s23  ;;  %v168_v46 = vpop.f32.mrb[3].mxu0 }
 0x218   :  { %v2125_v52 = vpack.c.bf16 %v168_v46, %v168_v46  ;;  %v313_v53 = vsel %vm311_vm3, %v2122_v51, 0 }
 0x219   :  { %229 = vrot.lane.b32.xlu1 %v2115_v45, %s2007_s23 }
 0x21a   :  { %v359_v54 = vsel %vm311_vm3, %v2125_v52, 0 }
 0x289   :  { %v180_v47 = vpop.permute.xlu0 %179 }
 0x28a   :  { %v186_v48 = vsel %vm181_vm2, %v180_v47, 0 }
 0x28b   :  { %1764 = vmatpush3.bf16.xpose.msra.mxu0 %v186_v48  ;;  %v230_v49 = vpop.permute.xlu1 %229 }
 0x28c   :  { %v235_v50 = vsel %vm181_vm2, %v230_v49, 0  ;;  %1775 = vmatprep.subr.bf16.mxu0 %v2005_v40 }
 0x28d   :  { %1770 = vmatpush3.bf16.xpose.msra.mxu1 %v235_v50 }
 0x28e   :  { %1781 = vmatprep.subr.bf16.mxu1 %v2005_v40 }
 0x292   :  { %1766 = vmatmul.mubr.msk.bf16.vlgmr.msra.gmra.mrb[4].mxu0 %vm181_vm2, %v2113_v42 }
 0x293   :  { %1776 = vmatpush3.bf16.msra.mxu0 %v313_v53  ;;  %1777 = vmatprep.mubr.msk.bf16.mxu0 %vm2006_vm1, %v2005_v40 }
 0x294   :  { %1772 = vmatmul.mubr.msk.bf16.vlgmr.msra.gmra.mrb[0].mxu1 %vm181_vm2, %v2115_v45  ;;  %1787 = vmatprep.subr.bf16.mxu0 %v2005_v40 }
 0x295   :  { %1782 = vmatpush3.bf16.msra.mxu1 %v359_v54  ;;  %1783 = vmatprep.mubr.msk.bf16.mxu1 %vm2006_vm1, %v2005_v40 }
 0x296   :  { %1793 = vmatprep.subr.bf16.mxu1 %v2005_v40 }
 0x365   :  { %v222_v59 = vpop.f32.mrb[4].mxu0 }
 0x366   :  { %v279_v60 = vsel %vm2144_vm4, %v222_v59, -1e+30  ;;  %v1767_v61 = vpop.f32.mrb[5].mxu0 }
 0x367   :  { %v225_v62 = vpop.f32.mrb[6].mxu0  ;;  %v271_v63 = vpop.f32.mrb[0].mxu1  ;;  %v282_v2 = vsel %vm281_vm5, %v279_v60, -inf }
 0x368   :  { %v280_v3 = vsel %vm2144_vm4, %v271_v63, -1e+30  ;;  %v1773_v4 = vpop.f32.mrb[1].mxu1  ;;  %283 = vmax.xlane.f32.xlu1 %v282_v2  ;;  %v1768_v5 = vpop.f32.mrb[7].mxu0 }
 0x369   :  { %v274_v6 = vpop.f32.mrb[2].mxu1  ;;  %v285_v7 = vsel %vm281_vm5, %v280_v3, -inf }
 0x36a   :  { %286 = vmax.xlane.f32.xlu0 %v285_v7  ;;  %v1774_v8 = vpop.f32.mrb[3].mxu1 }
 0x379   :  { %456 = vrot.lane.b32.xlu1 %v2115_v45, %s2008_s24 }
 0x3f5   :  { %v284_v9 = vpop.xlane.xlu1 %283 }
 0x3f6   :  { %v288_v10 = vsub.f32 %v279_v60, %v284_v9 }
 0x3f7   :  { %v287_v11 = vpop.xlane.xlu0 %286 }
 0x3f8   :  { %v290_v12 = vmul.f32 1.442695, %v288_v10  ;;  %v289_v13 = vsub.f32 %v280_v3, %v287_v11 }
 0x3f9   :  { %v457_v19 = vpop.permute.xlu1 %456 }
 0x3fa   :  { %1944 = vpow2.f32 %v290_v12  ;;  %v292_v14 = vmul.f32 1.442695, %v289_v13  ;;  %v462_v31 = vsel %vm181_vm2, %v457_v19, 0 }
 0x3fc   :  { %1946 = vpow2.f32 %v292_v14 }
 0x404   :  { %v1945_v15 = vpop.eup %1944 }
 0x405   :  { %v294_v16 = vsel %vm281_vm5, %v1945_v15, 0.0 }
 0x406   :  { %v1947_v17 = vpop.eup %1946  ;;  %295 = vadd.xlane.f32.xlu0 %v294_v16 }
 0x407   :  { %v297_v18 = vsel %vm281_vm5, %v1947_v17, 0.0 }
 0x408   :  { %298 = vadd.xlane.f32.xlu1 %v297_v18  ;;  %v1909_v18 = vld [vmem:[%s2436_s2 + $0x8] sm:$0xff]  }
 0x419   :  { %404 = vrot.lane.b32.xlu1 %v2113_v42, %s2009_s25 }
 0x41c   :  { %406 = vrot.lane.b32.xlu0 %v2113_v42, %s2008_s24 }
 0x41d   :  { %454 = vrot.lane.b32.xlu1 %v2115_v45, %s2009_s25 }
 0x493   :  { %v296_v20 = vpop.xlane.xlu0 %295 }
 0x494   :  { %1948 = vrcp.f32 %v296_v20 }
 0x495   :  { %v299_v21 = vpop.xlane.xlu1 %298 }
 0x496   :  { %1950 = vrcp.f32 %v299_v21 }
 0x497   :  { %v407_v26 = vpop.permute.xlu0 %406 }
 0x498   :  { %v412_v29 = vsel %vm181_vm2, %v407_v26, 0 }
 0x499   :  { %v405_v32 = vpop.permute.xlu1 %404 }
 0x49d   :  { %v455_v33 = vpop.permute.xlu1 %454 }
 0x49e   :  { %v1949_v23 = vpop.eup %1948 }
 0x49f   :  { %v302_v24 = vmul.f32 %v1949_v23, %v1945_v15  ;;  %v1908_v23 = vld [vmem:[%s2436_s2] sm:$0xff]  }
 0x4a0   :  { %v1951_v25 = vpop.eup %1950 }
 0x4a1   :  { %v303_v27 = vmul.f32 %v1951_v25, %v1947_v17  ;;  %v304_v28 = vpack.c.bf16 %v302_v24, %v302_v24 }
 0x4a3   :  { %1778 = vmatmul.mubr.msk.bf16.vlgmr.msra.gmra.mrb[8].mxu0 %vm281_vm5, %v304_v28  ;;  %v305_v30 = vpack.c.bf16 %v303_v27, %v303_v27 }
 0x4a4   :  { %1788 = vmatpush3.bf16.xpose.msra.mxu0 %v412_v29  ;;  %1789 = vmatprep.mubr.msk.bf16.mxu0 %vm2006_vm1, %v2005_v40 }
 0x4a5   :  { %1784 = vmatmul.mubr.msk.bf16.vlgmr.msra.gmra.mrb[4].mxu1 %vm281_vm5, %v305_v30  ;;  %1799 = vmatprep.subr.bf16.mxu0 %v2005_v40 }
 0x4a6   :  { %1794 = vmatpush3.bf16.xpose.msra.mxu1 %v462_v31  ;;  %1795 = vmatprep.mubr.msk.bf16.mxu1 %vm2006_vm1, %v2005_v40 }
 0x4a7   :  { %1805 = vmatprep.subr.bf16.mxu1 %v2005_v40 }
 0x4ab   :  { %1790 = vmatmul.mubr.msk.bf16.vlgmr.msra.gmra.mrb[12].mxu0 %vm181_vm2, %v405_v32 }
 0x4ac   :  { %1801 = vmatprep.mubr.msk.bf16.mxu0 %vm2006_vm1, %v2005_v40 }
 0x4ad   :  { %1796 = vmatmul.mubr.msk.bf16.vlgmr.msra.gmra.mrb[8].mxu1 %vm181_vm2, %v455_v33 }
 0x4ae   :  { %1807 = vmatprep.mubr.msk.bf16.mxu1 %vm2006_vm1, %v2005_v40 }
 0x576   :  { %v2178_v34 = vpop.f32.mrb[8].mxu0 }
 0x577   :  { %v1779_v35 = vpop.f32.mrb[9].mxu0 }
 0x578   :  { %v352_v36 = vpop.f32.mrb[10].mxu0  ;;  %v2180_v37 = vpop.f32.mrb[4].mxu1 }
 0x579   :  { %v401_v38 = vpack.c.bf16 %v2180_v37, %v2178_v34  ;;  %v1780_v39 = vpop.f32.mrb[11].mxu0  ;;  %v1785_v41 = vpop.f32.mrb[5].mxu1 }
 0x57a   :  { %v398_v43 = vpop.f32.mrb[6].mxu1 }
 0x57b   :  { %v1786_v44 = vpop.f32.mrb[7].mxu1 }
 0x57e   :  { %v448_v46 = vpop.f32.mrb[12].mxu0 }
 0x57f   :  { %v504_v47 = vsel %vm2144_vm4, %v448_v46, -1e+30  ;;  %v1791_v48 = vpop.f32.mrb[13].mxu0 }
 0x580   :  { %v451_v49 = vpop.f32.mrb[14].mxu0  ;;  %v498_v50 = vpop.f32.mrb[8].mxu1  ;;  %v506_v53 = vsel %vm281_vm5, %v504_v47, -inf }
 0x581   :  { %v505_v54 = vsel %vm2144_vm4, %v498_v50, -1e+30  ;;  %v1797_v55 = vpop.f32.mrb[9].mxu1  ;;  %507 = vmax.xlane.f32.xlu0 %v506_v53  ;;  %v1792_v57 = vpop.f32.mrb[15].mxu0 }
 0x582   :  { %v501_v59 = vpop.f32.mrb[10].mxu1  ;;  %v509_v60 = vsel %vm281_vm5, %v505_v54, -inf }
 0x583   :  { %510 = vmax.xlane.f32.xlu1 %v509_v60  ;;  %v1798_v61 = vpop.f32.mrb[11].mxu1 }
 0x594   :  { %580 = vrot.lane.b32.xlu1 %v2125_v52, %s2009_s25 }
 0x598   :  { %733 = vrot.lane.b32.xlu1 %v2113_v42, %s2010_s26 }
 0x59c   :  { %783 = vrot.lane.b32.xlu1 %v2115_v45, %s2010_s26 }
 0x5a0   :  { %781 = vrot.lane.b32.xlu1 %v2115_v45, %s2011_s27 }
 0x60e   :  { %v508_v62 = vpop.xlane.xlu0 %507 }
 0x60f   :  { %v512_v63 = vsub.f32 %v504_v47, %v508_v62 }
 0x610   :  { %v511_v2 = vpop.xlane.xlu1 %510 }
 0x611   :  { %v514_v3 = vmul.f32 1.442695, %v512_v63  ;;  %v513_v4 = vsub.f32 %v505_v54, %v511_v2 }
 0x613   :  { %1952 = vpow2.f32 %v514_v3  ;;  %v516_v5 = vmul.f32 1.442695, %v513_v4 }
 0x614   :  { %v581_v6 = vpop.permute.xlu1 %580 }
 0x615   :  { %1954 = vpow2.f32 %v516_v5  ;;  %v586_v7 = vsel %vm311_vm3, %v581_v6, 0 }
 0x616   :  { %1806 = vmatpush3.bf16.msra.mxu1 %v586_v7 }
 0x617   :  { %1817 = vmatprep.subr.bf16.mxu1 %v2005_v40 }
 0x618   :  { %v734_v25 = vpop.permute.xlu1 %733 }
 0x619   :  { %v739_v37 = vsel %vm181_vm2, %v734_v25, 0 }
 0x61c   :  { %v784_v26 = vpop.permute.xlu1 %783 }
 0x61d   :  { %v1953_v8 = vpop.eup %1952  ;;  %v789_v27 = vsel %vm181_vm2, %v784_v26, 0 }
 0x61e   :  { %v518_v9 = vsel %vm281_vm5, %v1953_v8, 0.0 }
 0x61f   :  { %v1955_v10 = vpop.eup %1954  ;;  %519 = vadd.xlane.f32.xlu0 %v518_v9 }
 0x620   :  { %v521_v11 = vsel %vm281_vm5, %v1955_v10, 0.0  ;;  %v782_v28 = vpop.permute.xlu1 %781 }
 0x623   :  { %522 = vadd.xlane.f32.xlu0 %v521_v11 }
 0x639   :  { %531 = vrot.lane.b32.xlu0 %v2122_v51, %s2009_s25 }
 0x63d   :  { %731 = vrot.lane.b32.xlu0 %v2113_v42, %s2011_s27 }
 0x6ac   :  { %v520_v12 = vpop.xlane.xlu0 %519 }
 0x6ad   :  { %1956 = vrcp.f32 %v520_v12 }
 0x6b0   :  { %v523_v13 = vpop.xlane.xlu0 %522 }
 0x6b1   :  { %1958 = vrcp.f32 %v523_v13 }
 0x6b4   :  { %v532_v14 = vpop.permute.xlu0 %531 }
 0x6b5   :  { %v537_v15 = vsel %vm311_vm3, %v532_v14, 0 }
 0x6b6   :  { %1800 = vmatpush3.bf16.msra.mxu0 %v537_v15 }
 0x6b7   :  { %v1957_v16 = vpop.eup %1956  ;;  %1811 = vmatprep.subr.bf16.mxu0 %v2005_v40 }
 0x6b8   :  { %v526_v17 = vmul.f32 %v1957_v16, %v1953_v8  ;;  %v732_v43 = vpop.permute.xlu0 %731 }
 0x6ba   :  { %v528_v19 = vpack.c.bf16 %v526_v17, %v526_v17 }
 0x6bb   :  { %v1959_v20 = vpop.eup %1958 }
 0x6bc   :  { %v527_v21 = vmul.f32 %v1959_v20, %v1955_v10  ;;  %1802 = vmatmul.mubr.msk.bf16.vlgmr.msra.gmra.mrb[16].mxu0 %vm281_vm5, %v528_v19 }
 0x6bd   :  { %1812 = vmatpush3.bf16.msra.mxu0 %v1909_v18  ;;  %1813 = vmatprep.mubr.msk.bf16.mxu0 %vm2006_vm1, %v2005_v40 }
 0x6be   :  { %v529_v24 = vpack.c.bf16 %v527_v21, %v527_v21  ;;  %1823 = vmatprep.subr.bf16.mxu0 %v2005_v40 }
 0x6c0   :  { %1808 = vmatmul.mubr.msk.bf16.vlgmr.msra.gmra.mrb[12].mxu1 %vm281_vm5, %v529_v24 }
 0x6c1   :  { %1818 = vmatpush3.bf16.msra.mxu1 %v1908_v23  ;;  %1819 = vmatprep.mubr.msk.bf16.mxu1 %vm2006_vm1, %v2005_v40 }
 0x6c2   :  { %1829 = vmatprep.subr.bf16.mxu1 %v2005_v40 }
 0x6c8   :  { %1820 = vmatmul.mubr.msk.bf16.vlgmr.msra.gmra.mrb[16].mxu1 %vm181_vm2, %v401_v38 }
 0x6c9   :  { %1831 = vmatprep.mubr.msk.bf16.mxu1 %vm2006_vm1, %v2005_v40 }
 0x6ca   :  { %1830 = vmatpush3.bf16.xpose.msra.mxu1 %v789_v27 }
 0x6cb   :  { %1841 = vmatprep.subr.bf16.mxu1 %v2005_v40 }
 0x6d1   :  { %1832 = vmatmul.mubr.msk.bf16.vlgmr.msra.gmra.mrb[20].mxu1 %vm181_vm2, %v782_v28 }
 0x6d2   :  { %1843 = vmatprep.mubr.msk.bf16.mxu1 %vm2006_vm1, %v2005_v40 }
 0x78f   :  { %v573_v29 = vpop.f32.mrb[16].mxu0 }
 0x790   :  { %v1803_v30 = vpop.f32.mrb[17].mxu0 }
 0x791   :  { %v576_v31 = vpop.f32.mrb[18].mxu0 }
 0x792   :  { %v1804_v32 = vpop.f32.mrb[19].mxu0 }
 0x793   :  { %v622_v33 = vpop.f32.mrb[12].mxu1 }
 0x794   :  { %v628_v34 = vpack.c.bf16 %v622_v33, %v573_v29  ;;  %v1809_v35 = vpop.f32.mrb[13].mxu1 }
 0x795   :  { %v625_v36 = vpop.f32.mrb[14].mxu1  ;;  %v1910_v35 = vld [vmem:[%s2436_s2 + $0x10] sm:$0xff]  }
 0x796   :  { %v1810_v38 = vpop.f32.mrb[15].mxu1  ;;  %1814 = vmatmul.mubr.msk.bf16.vlgmr.msra.gmra.mrb[20].mxu0 %vm181_vm2, %v628_v34 }
 0x797   :  { %1824 = vmatpush3.bf16.xpose.msra.mxu0 %v739_v37  ;;  %1825 = vmatprep.mubr.msk.bf16.mxu0 %vm2006_vm1, %v2005_v40 }
 0x798   :  { %1835 = vmatprep.subr.bf16.mxu0 %v2005_v40 }
 0x79b   :  { %v724_v39 = vpop.f32.mrb[16].mxu1 }
 0x79c   :  { %v1821_v41 = vpop.f32.mrb[17].mxu1 }
 0x79d   :  { %v727_v44 = vpop.f32.mrb[18].mxu1 }
 0x79e   :  { %v1822_v46 = vpop.f32.mrb[19].mxu1  ;;  %1826 = vmatmul.mubr.msk.bf16.vlgmr.msra.gmra.mrb[24].mxu0 %vm181_vm2, %v732_v43 }
 0x79f   :  { %1837 = vmatprep.mubr.msk.bf16.mxu0 %vm2006_vm1, %v2005_v40 }
 0x7a4   :  { %v825_v47 = vpop.f32.mrb[20].mxu1 }
 0x7a5   :  { %v832_v48 = vsel %vm2144_vm4, %v825_v47, -1e+30  ;;  %v1833_v49 = vpop.f32.mrb[21].mxu1 }
 0x7a6   :  { %v828_v50 = vpop.f32.mrb[22].mxu1  ;;  %v836_v53 = vsel %vm281_vm5, %v832_v48, -inf }
 0x7a7   :  { %837 = vmax.xlane.f32.xlu1 %v836_v53  ;;  %v1834_v54 = vpop.f32.mrb[23].mxu1 }
 0x7b8   :  { %905 = vrot.lane.b32.xlu1 %v2125_v52, %s2011_s27 }
 0x7bc   :  { %1010 = vrot.lane.b32.xlu1 %v2113_v42, %s2012_s8 }
 0x7c0   :  { %1060 = vrot.lane.b32.xlu1 %v2115_v45, %s2012_s8 }
 0x7c4   :  { %1058 = vrot.lane.b32.xlu1 %v2115_v45, %s2013_s9 }
 0x834   :  { %v838_v55 = vpop.xlane.xlu1 %837 }
 0x835   :  { %v840_v60 = vsub.f32 %v832_v48, %v838_v55 }
 0x837   :  { %v843_v61 = vmul.f32 1.442695, %v840_v60 }
 0x838   :  { %v906_v57 = vpop.permute.xlu1 %905 }
 0x839   :  { %v911_v59 = vsel %vm311_vm3, %v906_v57, 0  ;;  %1960 = vpow2.f32 %v843_v61 }
 0x83a   :  { %1842 = vmatpush3.bf16.msra.mxu1 %v911_v59 }
 0x83b   :  { %1853 = vmatprep.subr.bf16.mxu1 %v2005_v40 }
 0x83c   :  { %v1011_v21 = vpop.permute.xlu1 %1010 }
 0x83d   :  { %v1016_v24 = vsel %vm181_vm2, %v1011_v21, 0 }
 0x843   :  { %v1961_v10 = vpop.eup %1960 }
 0x844   :  { %v848_v12 = vsel %vm281_vm5, %v1961_v10, 0.0 }
 0x869   :  { %v674_v62 = vpop.f32.mrb[20].mxu0 }
 0x86a   :  { %v2250_v63 = vadd.f32 %v724_v39, %v674_v62  ;;  %v1815_v2 = vpop.f32.mrb[21].mxu0 }
 0x86b   :  { %v677_v3 = vpop.f32.mrb[22].mxu0 }
 0x86c   :  { %v2252_v4 = vadd.f32 %v727_v44, %v677_v3  ;;  %v1816_v5 = vpop.f32.mrb[23].mxu0  ;;  %v1061_v44 = vpop.permute.xlu1 %1060 }
 0x86d   :  { %v1066_v50 = vsel %vm181_vm2, %v1061_v44, 0 }
 0x870   :  { %v1059_v54 = vpop.permute.xlu1 %1058 }
 0x871   :  { %v775_v6 = vpop.f32.mrb[24].mxu0 }
 0x872   :  { %v831_v45 = vsel %vm2144_vm4, %v775_v6, -1e+30  ;;  %v1827_v7 = vpop.f32.mrb[25].mxu0 }
 0x873   :  { %v778_v8 = vpop.f32.mrb[26].mxu0  ;;  %v833_v9 = vsel %vm281_vm5, %v831_v45, -inf }
 0x874   :  { %834 = vmax.xlane.f32.xlu0 %v833_v9  ;;  %v1828_v11 = vpop.f32.mrb[27].mxu0 }
 0x878   :  { %849 = vadd.xlane.f32.xlu0 %v848_v12 }
 0x901   :  { %v835_v13 = vpop.xlane.xlu0 %834 }
 0x902   :  { %v839_v14 = vsub.f32 %v831_v45, %v835_v13 }
 0x904   :  { %v841_v15 = vmul.f32 1.442695, %v839_v14 }
 0x905   :  { %v850_v16 = vpop.xlane.xlu0 %849 }
 0x906   :  { %1962 = vpow2.f32 %v841_v15 }
 0x907   :  { %1964 = vrcp.f32 %v850_v16 }
 0x910   :  { %v1963_v17 = vpop.eup %1962 }
 0x911   :  { %v1965_v18 = vpop.eup %1964  ;;  %v845_v19 = vsel %vm281_vm5, %v1963_v17, 0.0 }
 0x912   :  { %v854_v20 = vmul.f32 %v1965_v18, %v1961_v10  ;;  %846 = vadd.xlane.f32.xlu0 %v845_v19 }
 0x914   :  { %v856_v23 = vpack.c.bf16 %v854_v20, %v854_v20 }
 0x916   :  { %1844 = vmatmul.mubr.msk.bf16.vlgmr.msra.gmra.mrb[24].mxu1 %vm281_vm5, %v856_v23 }
 0x917   :  { %1854 = vmatpush3.bf16.xpose.msra.mxu1 %v1016_v24  ;;  %1855 = vmatprep.mubr.msk.bf16.mxu1 %vm2006_vm1, %v2005_v40 }
 0x918   :  { %1865 = vmatprep.subr.bf16.mxu1 %v2005_v40 }
 0x928   :  { %857 = vrot.lane.b32.xlu0 %v2122_v51, %s2011_s27 }
 0x92c   :  { %1008 = vrot.lane.b32.xlu0 %v2113_v42, %s2013_s9 }
 0x99f   :  { %v847_v25 = vpop.xlane.xlu0 %846 }
 0x9a0   :  { %1966 = vrcp.f32 %v847_v25 }
 0x9a3   :  { %v858_v26 = vpop.permute.xlu0 %857 }
 0x9a4   :  { %v863_v27 = vsel %vm311_vm3, %v858_v26, 0  ;;  %v1911_v26 = vld [vmem:[%s2436_s2 + $0x18] sm:$0xff]   ;;  %s2014_s2 = smov [#allocation2]  }
 0x9a5   :  { %1836 = vmatpush3.bf16.msra.mxu0 %v863_v27  ;;  %s1626_s16 = sshll.u32 %s2014_s2, 4  ;;  %s1627_s16 = int_to_ptr.vmem [resolvable:$true] %s1626_s16 }
 0x9a6   :  { %1847 = vmatprep.subr.bf16.mxu0 %v2005_v40  ;;  %s1980_s17 = scalar_lea.vmem %s1627_s16, 256  ;;  %p1985_p1 = scmp.lt.s32.totalorder %s1627_s16, %s1627_s16 }
 0x9a7   :  { %v1009_v28 = vpop.permute.xlu0 %1008  ;;  %p1981_p0 = scmp.ne.s32.totalorder %s1627_s16, %s1980_s17  ;;  %p1986_p2 = scmp.lt.s32.totalorder %s1980_s17, %s1980_s17 }
 0x9a8   :  { %1856 = vmatmul.mubr.msk.bf16.vlgmr.msra.gmra.mrb[28].mxu1 %vm181_vm2, %v1009_v28 }
 0x9a9   :  { %1867 = vmatprep.mubr.msk.bf16.mxu1 %vm2006_vm1, %v2005_v40  ;;  %p1987_p3 = por %p1986_p2, %p1985_p1 }
 0x9aa   :  { %v1967_v29 = vpop.eup %1966 }
 0x9ab   :  { %v853_v30 = vmul.f32 %v1967_v29, %v1963_v17  ;;  %p1988_p4 = pnand %p1987_p3, %p1981_p0 }
 0x9ad   :  { %v855_v31 = vpack.c.bf16 %v853_v30, %v853_v30 }
 0x9af   :  { %1838 = vmatmul.mubr.msk.bf16.vlgmr.msra.gmra.mrb[28].mxu0 %vm281_vm5, %v855_v31 }
 0x9b0   :  { %1849 = vmatprep.mubr.msk.bf16.mxu0 %vm2006_vm1, %v2005_v40  ;;  %1848 = vmatpush3.bf16.msra.mxu0 %v1910_v35 }
 0x9b1   :  { %1859 = vmatprep.subr.bf16.mxu0 %v2005_v40 }
 0x9e9   :  { %v947_v42 = vpop.f32.mrb[24].mxu1 }
 0x9ea   :  { %v1845_v32 = vpop.f32.mrb[25].mxu1 }
 0x9eb   :  { %v950_v33 = vpop.f32.mrb[26].mxu1 }
 0x9ec   :  { %v1846_v34 = vpop.f32.mrb[27].mxu1 }
 0xa7b   :  { %v1052_v36 = vpop.f32.mrb[28].mxu1 }
 0xa7c   :  { %v1108_v37 = vsel %vm2144_vm4, %v1052_v36, -1e+30  ;;  %v1857_v38 = vpop.f32.mrb[29].mxu1 }
 0xa7d   :  { %v1055_v39 = vpop.f32.mrb[30].mxu1  ;;  %v1110_v41 = vsel %vm281_vm5, %v1108_v37, -inf }
 0xa7e   :  { %1111 = vmax.xlane.f32.xlu0 %v1110_v41  ;;  %v1858_v43 = vpop.f32.mrb[31].mxu1 }
 0xa82   :  { %v899_v46 = vpop.f32.mrb[28].mxu0 }
 0xa83   :  { %v953_v47 = vpack.c.bf16 %v947_v42, %v899_v46  ;;  %v1839_v48 = vpop.f32.mrb[29].mxu0 }
 0xa84   :  { %v902_v49 = vpop.f32.mrb[30].mxu0 }
 0xa85   :  { %v1840_v53 = vpop.f32.mrb[31].mxu0  ;;  %1850 = vmatmul.mubr.msk.bf16.vlgmr.msra.gmra.mrb[32].mxu0 %vm181_vm2, %v953_v47 }
 0xa86   :  { %1860 = vmatpush3.bf16.xpose.msra.mxu0 %v1066_v50  ;;  %1861 = vmatprep.mubr.msk.bf16.mxu0 %vm2006_vm1, %v2005_v40 }
 0xa87   :  { %1871 = vmatprep.subr.bf16.mxu0 %v2005_v40 }
 0xa8d   :  { %1862 = vmatmul.mubr.msk.bf16.vlgmr.msra.gmra.mrb[36].mxu0 %vm181_vm2, %v1059_v54 }
 0xa8e   :  { %1873 = vmatprep.mubr.msk.bf16.mxu0 %vm2006_vm1, %v2005_v40 }
 0xb0b   :  { %v1112_v55 = vpop.xlane.xlu0 %1111 }
 0xb0c   :  { %v1116_v57 = vsub.f32 %v1108_v37, %v1112_v55 }
 0xb0e   :  { %v1118_v59 = vmul.f32 1.442695, %v1116_v57 }
 0xb10   :  { %1968 = vpow2.f32 %v1118_v59 }
 0xb1a   :  { %v1969_v60 = vpop.eup %1968 }
 0xb1b   :  { %v1122_v61 = vsel %vm281_vm5, %v1969_v60, 0.0 }
 0xb1c   :  { %1123 = vadd.xlane.f32.xlu0 %v1122_v61  ;;  %v1914_v61 = vld [vmem:[%s2437_s3 + $0x4] ss:$8 sps:$4 sm:$0xff]  }
 0xb58   :  { %v999_v62 = vpop.f32.mrb[32].mxu0 }
 0xb59   :  { %v1006_v2 = vadd.f32 %v999_v62, %v2250_v63  ;;  %v1851_v3 = vpop.f32.mrb[33].mxu0  ;;  %v1912_v62 = vld [vmem:[%s2437_s3] ss:$8 sps:$4 sm:$0xff]  }
 0xb5a   :  { %v1002_v5 = vpop.f32.mrb[34].mxu0  ;;  %v1915_v3 = vld [vmem:[%s2437_s3 + $0x10] ss:$8 sps:$4 sm:$0xff]  }
 0xb5b   :  { %v1007_v6 = vadd.f32 %v1002_v5, %v2252_v4  ;;  %v1852_v45 = vpop.f32.mrb[35].mxu0  ;;  %v1920_v5 = vld [vmem:[%s2437_s3 + $0x24] ss:$8 sps:$4 sm:$0xff]  }
 0xb5c   :  { %v1923_v45 = vld [vmem:[%s2437_s3 + $0x34] ss:$8 sps:$4 sm:$0xff]  }
 0xb60   :  { %v1102_v7 = vpop.f32.mrb[36].mxu0 }
 0xb61   :  { %v1109_v8 = vsel %vm2144_vm4, %v1102_v7, -1e+30  ;;  %v1863_v9 = vpop.f32.mrb[37].mxu0  ;;  %v1921_v7 = vld [vmem:[%s2437_s3 + $0x30] ss:$8 sps:$4 sm:$0xff]  }
 0xb62   :  { %v1105_v10 = vpop.f32.mrb[38].mxu0  ;;  %v1113_v11 = vsel %vm281_vm5, %v1109_v8, -inf  ;;  %v1925_v9 = vld [vmem:[%s2438_s4] sm:$0xff]  }
 0xb63   :  { %1114 = vmax.xlane.f32.xlu1 %v1113_v11  ;;  %v1864_v12 = vpop.f32.mrb[39].mxu0  ;;  %v1926_v10 = vld [vmem:[%s2438_s4 + $0x48] sm:$0xff]  }
 0xb64   :  { %v1927_v11 = vld [vmem:[%s2438_s4 + $0x8] sm:$0xff]   ;;  %v1928_v12 = vld [vmem:[%s2438_s4 + $0x50] sm:$0xff]  }
 0xb74   :  { %1182 = vrot.lane.b32.xlu1 %v2125_v52, %s2013_s9 }
 0xba9   :  { %v1124_v17 = vpop.xlane.xlu0 %1123 }
 0xbf0   :  { %v1115_v13 = vpop.xlane.xlu1 %1114 }
 0xbf1   :  { %v1117_v63 = vsub.f32 %v1109_v8, %v1115_v13  ;;  %v1924_v8 = vld [vmem:[%s2438_s4 + $0x40] sm:$0xff]   ;;  %v1929_v13 = vld [vmem:[%s2438_s4 + $0x10] sm:$0xff]  }
 0xbf3   :  { %v1120_v14 = vmul.f32 1.442695, %v1117_v63  ;;  %v1930_v63 = vld [vmem:[%s2438_s4 + $0x58] sm:$0xff]  }
 0xbf4   :  { %v1183_v15 = vpop.permute.xlu1 %1182 }
 0xbf5   :  { %1970 = vpow2.f32 %v1120_v14  ;;  %v1188_v4 = vsel %vm311_vm3, %v1183_v15, 0  ;;  %v1931_v14 = vld [vmem:[%s2438_s4 + $0x18] sm:$0xff]   ;;  %v1932_v15 = vld [vmem:[%s2438_s4 + $0x60] sm:$0xff]  }
 0xbf6   :  { %1872 = vmatpush3.bf16.msra.mxu0 %v1188_v4  ;;  %1972 = vrcp.f32 %v1124_v17  ;;  %v1933_v4 = vld [vmem:[%s2438_s4 + $0x20] sm:$0xff]  }
 0xbf7   :  { %1395 = vmatprep.subr.bf16.mxu0 %v1914_v61 }
 0xbff   :  { %v1971_v16 = vpop.eup %1970 }
 0xc00   :  { %v1125_v58 = vsel %vm281_vm5, %v1971_v16, 0.0  ;;  %v1973_v18 = vpop.eup %1972 }
 0xc01   :  { %1126 = vadd.xlane.f32.xlu0 %v1125_v58  ;;  %v1130_v52 = vmul.f32 %v1973_v18, %v1969_v60 }
 0xc03   :  { %v1132_v23 = vpack.c.bf16 %v1130_v52, %v1130_v52 }
 0xc17   :  { %1134 = vrot.lane.b32.xlu0 %v2122_v51, %s2013_s9 }
 0xc8e   :  { %v1127_v19 = vpop.xlane.xlu0 %1126 }
 0xc8f   :  { %1974 = vrcp.f32 %v1127_v19 }
 0xc92   :  { %v1135_v20 = vpop.permute.xlu0 %1134 }
 0xc93   :  { %v1140_v21 = vsel %vm311_vm3, %v1135_v20, 0 }
 0xc94   :  { %1866 = vmatpush3.bf16.msra.mxu1 %v1140_v21 }
 0xc95   :  { %1877 = vmatprep.subr.bf16.mxu1 %v2005_v40 }
 0xc97   :  { %1868 = vmatmul.mubr.msk.bf16.vlgmr.msra.gmra.mrb[32].mxu1 %vm281_vm5, %v1132_v23  ;;  %v1673_v23 = vld [vmem:[%s2439_s5 + $0x2] ss:$0 sm:$0xff] }
 0xc98   :  { %1879 = vmatprep.mubr.msk.bf16.mxu1 %vm2006_vm1, %v2005_v40  ;;  %1878 = vmatpush3.bf16.msra.mxu1 %v1911_v26 }
 0xc99   :  { %v1975_v24 = vpop.eup %1974  ;;  %1741 = vmatprep.subr.bf16.mxu1 %v1924_v8 }
 0xc9a   :  { %v1131_v51 = vmul.f32 %v1975_v24, %v1971_v16  ;;  %v1934_v16 = vld [vmem:[%s2438_s4 + $0x68] sm:$0xff]  }
 0xc9c   :  { %v1133_v25 = vpack.c.bf16 %v1131_v51, %v1131_v51 }
 0xc9e   :  { %1874 = vmatmul.mubr.msk.bf16.vlgmr.msra.gmra.mrb[40].mxu0 %vm281_vm5, %v1133_v25 }
 0xc9f   :  { %1427 = vmatprep.mubr.bf16.mxu0 %v2004_v22  ;;  %v1672_v22 = vld [vmem:[%s2439_s5 + $0x4] ss:$0 sm:$0xff]  ;;  %1396 = vmatpush1.bf16.msra.mxu0 %v1912_v62 }
 0xd6a   :  { %v1176_v27 = vpop.f32.mrb[32].mxu1 }
 0xd6b   :  { %v1869_v28 = vpop.f32.mrb[33].mxu1 }
 0xd6c   :  { %v1179_v29 = vpop.f32.mrb[34].mxu1 }
 0xd6d   :  { %v1870_v30 = vpop.f32.mrb[35].mxu1 }
 0xd71   :  { %v1224_v31 = vpop.f32.mrb[40].mxu0 }
 0xd72   :  { %v1230_v42 = vpack.c.bf16 %v1224_v31, %v1176_v27  ;;  %v1875_v32 = vpop.f32.mrb[41].mxu0  ;;  %v1674_v27 = vld [vmem:[%s2439_s5 + $0x3] ss:$0 sm:$0xff] }
 0xd73   :  { %v1227_v40 = vpop.f32.mrb[42].mxu0  ;;  %v1936_v32 = vld [vmem:[%s2438_s4 + $0x70] sm:$0xff]  }
 0xd74   :  { %v1876_v33 = vpop.f32.mrb[43].mxu0  ;;  %1880 = vmatmul.mubr.msk.bf16.vlgmr.msra.gmra.mrb[36].mxu1 %vm181_vm2, %v1230_v42  ;;  %v1935_v42 = vld [vmem:[%s2438_s4 + $0x28] sm:$0xff]   ;;  %v1937_v40 = vld [vmem:[%s2438_s4 + $0x30] sm:$0xff]  }
 0xd75   :  { %1742 = vmatpush3.bf16.msra.mxu1 %v1925_v9  ;;  %v1938_v33 = vld [vmem:[%s2438_s4 + $0x78] sm:$0xff]  }
 0xd76   :  { %1743 = vmatprep.subr.bf16.mxu1 %v1926_v10 }
 0xd79   :  { %1744 = vmatpush3.bf16.msra.mxu1 %v1927_v11 }
 0xd7a   :  { %1745 = vmatprep.subr.bf16.mxu1 %v1928_v12 }
 0xd7d   :  { %1746 = vmatpush3.bf16.msra.mxu1 %v1929_v13 }
 0xd7e   :  { %1747 = vmatprep.subr.bf16.mxu1 %v1930_v63 }
 0xd81   :  { %1748 = vmatpush3.bf16.msra.mxu1 %v1931_v14 }
 0xd82   :  { %1749 = vmatprep.subr.bf16.mxu1 %v1932_v15 }
 0xd85   :  { %1750 = vmatpush3.bf16.msra.mxu1 %v1933_v4 }
 0xd86   :  { %1751 = vmatprep.subr.bf16.mxu1 %v1934_v16 }
 0xd89   :  { %1752 = vmatpush3.bf16.msra.mxu1 %v1935_v42 }
 0xd8a   :  { %1753 = vmatprep.subr.bf16.mxu1 %v1936_v32 }
 0xd8d   :  { %1754 = vmatpush3.bf16.msra.mxu1 %v1937_v40 }
 0xd8e   :  { %1755 = vmatprep.subr.bf16.mxu1 %v1938_v33 }
 0xe47   :  { %v1276_v34 = vpop.f32.mrb[36].mxu1 }
 0xe48   :  { %v1283_v35 = vadd.f32 %v1276_v34, %v1006_v2  ;;  %v1881_v36 = vpop.f32.mrb[37].mxu1  ;;  %v1917_v2 = vld [vmem:[%s2437_s3 + $0x14] ss:$8 sps:$4 sm:$0xff]  }
 0xe49   :  { %v1279_v37 = vpop.f32.mrb[38].mxu1  ;;  %1397 = vmatprep.subr.bf16.mxu0 %v1917_v2  ;;  %v1939_v34 = vld [vmem:[%s2438_s4 + $0x38] sm:$0xff]   ;;  %v1340_v36 = vld [vmem:[%s2440_s6] sm:$0x3] }
 0xe4a   :  { %v1285_v38 = vadd.f32 %v1283_v35, %v2060_v0  ;;  %v1284_v39 = vadd.f32 %v1279_v37, %v1007_v6  ;;  %v1882_v41 = vpop.f32.mrb[39].mxu1  ;;  %1398 = vmatpush1.bf16.msra.mxu0 %v1915_v3  ;;  %v1918_v6 = vld [vmem:[%s2437_s3 + $0x20] ss:$8 sps:$4 sm:$0xff]   ;;  %1756 = vmatpush3.bf16.msra.mxu1 %v1939_v34  ;;  %v1344_v35 = vsub.s32 0, %v2141_v56 }
 0xe4b   :  { %1399 = vmatprep.subr.bf16.mxu0 %v1920_v5 }
 0xe4c   :  { %v2318_v43 = vadd.f32 %v1672_v22, %v1285_v38  ;;  %v1286_v44 = vadd.f32 %v1284_v39, %v2065_v1  ;;  %v1345_v37 = vrot.slane %v1340_v36, %v1344_v35 }
 0xe4e   :  { %v2321_v46 = vadd.f32 %v1672_v22, %v1286_v44  ;;  %v1293_v47 = vsel %vm36_vm0, %v2318_v43, 0.0  ;;  %1400 = vmatpush1.bf16.msra.mxu0 %v1918_v6  ;;  %v1348_v22 = vsub.s32 1, %v2141_v56  ;;  %v1684_v56 = vld [vmem:[%s2439_s5 + $0x5] ss:$0 sm:$0xff] }
 0xe4f   :  { %1294 = vadd.xlane.f32.xlu1 %v1293_v47  ;;  %1401 = vmatprep.subr.bf16.mxu0 %v1923_v45 }
 0xe50   :  { %v1296_v48 = vsel %vm36_vm0, %v2321_v46, 0.0  ;;  %v1349_v38 = vrot.slane %v1340_v36, %v1348_v22 }
 0xe51   :  { %1297 = vadd.xlane.f32.xlu0 %v1296_v48 }
 0xe52   :  { %1402 = vmatpush1.bf16.msra.mxu0 %v1921_v7 }
 0xedc   :  { %v1295_v49 = vpop.xlane.xlu1 %1294 }
 0xedd   :  { %v1299_v50 = vmul.f32 0.015625, %v1295_v49 }
 0xede   :  { %v1298_v53 = vpop.xlane.xlu0 %1297 }
 0xedf   :  { %v1301_v0 = vsub.f32 %v2318_v43, %v1299_v50  ;;  %v1300_v54 = vmul.f32 0.015625, %v1298_v53 }
 0xee1   :  { %v1302_v55 = vsub.f32 %v2321_v46, %v1300_v54  ;;  %v1303_v57 = vmul.f32 %v1301_v0, %v1301_v0 }
 0xee3   :  { %v1305_v1 = vsel %vm36_vm0, %v1303_v57, 0.0  ;;  %v1304_v59 = vmul.f32 %v1302_v55, %v1302_v55 }
 0xee4   :  { %1306 = vadd.xlane.f32.xlu0 %v1305_v1 }
 0xee5   :  { %v1308_v60 = vsel %vm36_vm0, %v1304_v59, 0.0 }
 0xee6   :  { %1309 = vadd.xlane.f32.xlu1 %v1308_v60 }
 0xf71   :  { %v1307_v58 = vpop.xlane.xlu0 %1306 }
 0xf72   :  { %v1311_v17 = vmul.f32 0.015625, %v1307_v58 }
 0xf73   :  { %v1310_v18 = vpop.xlane.xlu1 %1309 }
 0xf74   :  { %v1313_v19 = vadd.f32 1e-05, %v1311_v17  ;;  %v1312_v52 = vmul.f32 0.015625, %v1310_v18 }
 0xf76   :  { %1976 = vrsqrt.f32 %v1313_v19  ;;  %v1314_v20 = vadd.f32 1e-05, %v1312_v52 }
 0xf78   :  { %1978 = vrsqrt.f32 %v1314_v20 }
 0xf80   :  { %v1977_v21 = vpop.eup %1976 }
 0xf81   :  { %v1317_v24 = vmul.f32 %v1977_v21, %v1301_v0 }
 0xf82   :  { %v1979_v51 = vpop.eup %1978 }
 0xf83   :  { %v1323_v25 = vmul.f32 %v1673_v23, %v1317_v24  ;;  %v1318_v26 = vmul.f32 %v1979_v51, %v1302_v55 }
 0xf85   :  { %v1324_v28 = vmul.f32 %v1673_v23, %v1318_v26  ;;  %v1329_v29 = vadd.f32 %v1674_v27, %v1323_v25 }
 0xf87   :  { %v1330_v30 = vadd.f32 %v1674_v27, %v1324_v28 }
 0xf89   :  { %v1331_v31 = vpack.c.bf16 %v1330_v30, %v1329_v29 }
 0xf8b   :  { %1683 = vmatmul.mubr.msk.bf16.vlgmr.msra.gmra.mrb[44].mxu0 %vm36_vm0, %v1331_v31 }
0x105e   :  { %v1429_v39 = vpop.f32.mrb[44].mxu0 }
0x105f   :  { %v1430_v41 = vadd.f32 %v1429_v39, %v1345_v37  ;;  %v1431_v44 = vpop.f32.mrb[45].mxu0 }
0x1060   :  { %v1432_v47 = vadd.f32 %v1431_v44, %v1349_v38  ;;  %v1433_v48 = vpop.f32.mrb[46].mxu0 }
0x1061   :  { %v1434_v49 = vadd.f32 %v1433_v48, %v1345_v37  ;;  %v1435_v50 = vpop.f32.mrb[47].mxu0  ;;  %v1438_v0 = vmax.f32 %v1430_v41, 0.0 }
0x1062   :  { %v1436_v53 = vadd.f32 %v1435_v50, %v1349_v38  ;;  %v1439_v55 = vmax.f32 %v1432_v47, 0.0 }
0x1063   :  { %v1440_v54 = vmax.f32 %v1434_v49, 0.0 }
0x1064   :  { %v1441_v57 = vmax.f32 %v1436_v53, 0.0 }
0x1065   :  { %v1442_v1 = vpack.c.bf16 %v1440_v54, %v1438_v0 }
0x1066   :  { %v1443_v59 = vpack.c.bf16 %v1441_v57, %v1439_v55 }
0x1068   :  { %1608 = vmatprep.mubr.bf16.mxu1 %v1443_v59 }
0x1069   :  { %1609 = vmatmul.mubr.bf16.vlgmr.msra.gmra.mrb[40].mxu1 %v1442_v1 }
0x113c   :  { %v1757_v60 = vpop.f32.mrb[40].mxu1 }
0x113d   :  { %v1758_v61 = vpop.f32.mrb[41].mxu1 }
0x113e   :  { %v1759_v62 = vadd.f32 %v1758_v61, %v1757_v60  ;;  %v1760_v2 = vpop.f32.mrb[42].mxu1 }
0x113f   :  { %v1761_v3 = vpop.f32.mrb[43].mxu1 }
0x1140   :  { %v1611_v5 = vadd.f32 %v1759_v62, %v1684_v56  ;;  %v1762_v6 = vadd.f32 %v1761_v3, %v1760_v2 }
0x1142   :  { %v1617_v45 = vadd.f32 %v1611_v5, %v2318_v43  ;;  %v1614_v7 = vadd.f32 %v1762_v6, %v1684_v56 }
0x1144   :  { %1619 = vst.msk [vmem:[#allocation2] sm:$0xff] %vm36_vm0, %v1617_v45  ;;  %v1618_v8 = vadd.f32 %v1614_v7, %v2321_v46 }
0x1146   :  { %1620 = vst.msk [vmem:[#allocation2 + $0x8] sm:$0xff] %vm36_vm0, %v1618_v8 }
0x1147   :  { %1991 = shalt.err (!%p1988_p4)
}
0x1148   :  { %s1992_s19 = scalar_lea.hbm %s2441_s7, 256 }
0x1149   :  { %p1993_p5 = scmp.ne.s32.totalorder %s2441_s7, %s1992_s19  ;;  %p1996_p6 = scmp.lt.u32.totalorder %s1992_s19, %s2441_s7 }
0x114b   :  { %p1998_p7 = pnand %p1996_p6, %p1993_p5 }
0x114d   :  { %2001 = shalt.err (!%p1998_p7)
}
0x114e   :  { %s2015_s23 = smov 128   ;;  %s2016_s24 = smov 8  }
0x114f   :  { %1632 = dma.vmem_to_hbm [thread:$0]  %s1627_s16, 256, %s2441_s7, [#allocation3], %s2015_s23, %s2015_s23, %s2016_s24  }
0x1150   :  { %2002 = dma.done.wait [#allocation3], 256  }
0x1151   :  { %2003 = vsyncadd [#allocation3], 4294967040 }
0x1152   :  { %1636 = vsyncpa [#allocation3], 1 }

</bundles_post_ra>
